<compile_context>
chip_gen: v7x
topology: tpu7x:2x2x1
jax: 0.10.0
libtpu: 0.0.40
codegen_flags: <defaults>
</compile_context>

<pallas_src>
import functools

import jax
import jax.numpy as jnp
import numpy as np
from jax.experimental import pallas as pl
from jax.experimental.pallas import tpu as pltpu


def _multi_gat_kernel(x_ref, adj_ref, w_ref, a_ref, o_ref, *,
                      alpha, n_heads, f_hid, n_nodes, batch_block):
    # x_ref:   (TB*N, F_in)       TB batch elements of node features
    # adj_ref: (N, N) int8        shared adjacency (non-zero = edge)
    # w_ref:   (F_in, H*F_hid)    all head projections, head-major columns
    # a_ref:   (H*F_hid, 2H) f32  block-diagonal attention vectors:
    #                               col 2h   = a_h[:F_hid]  ("j" term)
    #                               col 2h+1 = a_h[F_hid:]  ("i" term)
    # o_ref:   (TB*N, H*F_hid)    concat(heads) + x  (the MultiGAT output)
    n = n_nodes
    x = x_ref[...]

    # One fused projection for ALL batch rows and heads: a single MXU matmul
    # with M = TB*N (batch folded into M), f32 accumulation.
    h_all = jnp.dot(x, w_ref[...], preferred_element_type=jnp.float32)

    # All attention-logit terms in one MXU matmul, kept in f32 (tiny K; bf16
    # here would only add cast filler and softmax drift):
    #   scores[:, 2h]   = h_h . a_h[:F_hid]   ("j" term)
    #   scores[:, 2h+1] = h_h . a_h[F_hid:]   ("i" term)
    scores = jnp.dot(h_all, a_ref[...], preferred_element_type=jnp.float32)
    scores_t = jnp.transpose(scores)                      # (2H, TB*N), one XLU transpose

    adj_mask = adj_ref[...].astype(jnp.float32) > 0.0     # (N, N)
    neg_inf = jnp.float32(-1e12)
    x_res = x.astype(jnp.float32)                         # residual in f32

    # Per-(batch, head) attention.  TB and H are small -> static unroll; each
    # head's result is stored straight into its output column slice so the
    # (N, N) temporaries die at the end of every iteration (no concat).
    # TODO(synk): for production N, tile the key (j) axis flash-style (online
    # max/sum) and stream adj in (N, TK) int8 tiles so the per-head (N, N)
    # intermediates never exceed v7x's 64 MiB VMEM.
    for tb in range(batch_block):
        r0 = tb * n
        h_blk = h_all[r0:r0 + n, :]                       # (N, H*F_hid) f32
        x_blk = x_res[r0:r0 + n, :]                       # (N, F_in)    f32
        for h in range(n_heads):
            c0 = h * f_hid
            h_h = h_blk[:, c0:c0 + f_hid]                 # (N, F_hid)
            s_j = scores_t[2 * h:2 * h + 1, r0:r0 + n]    # (1, N)  "j" term
            s_i = scores[r0:r0 + n, 2 * h + 1:2 * h + 2]  # (N, 1)  "i" term

            # e[i, j] = LeakyReLU(a2 . h_i + a1 . h_j), then adjacency mask.
            e = s_i + s_j                                             # (N, N)
            e = jnp.where(e > 0, e, jnp.float32(alpha) * e)           # LeakyReLU
            e = jnp.where(adj_mask, e, neg_inf)

            # Row softmax (dim=2 in the PyTorch code), f32 throughout.  Rows
            # are never fully masked because adj carries self-loops.
            e = e - jnp.max(e, axis=-1, keepdims=True)
            p = jnp.exp(e)
            denom = jnp.sum(p, axis=-1, keepdims=True)
            r = pl.reciprocal(denom, approx=True)         # EUP slot
            r = r * (2.0 - denom * r)                     # one Newton step
            attn = p * r

            # out = attn @ h, inf-safe ELU, per-head residual (+h_h) and the
            # MultiGAT residual (+x) fused, stored into the output slice.
            out_h = jnp.dot(attn, h_h, preferred_element_type=jnp.float32)
            out_h = jnp.where(out_h > 0, out_h,
                              jnp.exp(jnp.minimum(out_h, 0.0)) - 1.0)
            out_h = out_h + h_h + x_blk[:, c0:c0 + f_hid]
            o_ref[r0:r0 + n, c0:c0 + f_hid] = out_h.astype(o_ref.dtype)
    # TODO(synk): a fully lane-dense writeback (F_out=32 < 128 lanes) would
    # relay the (TB*N, F_out) slab to (1, TB*N*F_out) before storing; needs a
    # measured relayout-vs-store trade-off, so only the TB fold is done here.


def _pick_batch_block(b, n, target_rows=256):
    """Largest divisor TB of b with TB*n <= target_rows, keeping >= 2 grid
    steps (both v7x TensorCores busy) whenever b allows it."""
    best = 1
    for tb in range(1, b + 1):
        if b % tb != 0:
            continue
        if tb * n > target_rows:
            continue
        if b // tb >= 2:
            best = tb
    return best


def multi_gat_forward(x, adj, w_all, a_all, *, alpha,
                      compute_dtype=jnp.float32, batch_block=None):
    """x: (B, N, F_in), adj: (N, N), w_all: (H, F_in, F_hid),
    a_all: (H, 2, F_hid).  Returns (B, N, H*F_hid) (== F_in for the residual).

    compute_dtype only controls how x / W are stored and DMA'd (bf16 halves
    their HBM traffic and feeds the v6e/v7x MXU fast path); every in-kernel
    step after the projection stays in float32.  Keep the f32 default on v5e.
    """
    B, N, F_in = x.shape
    H, _, F_hid = w_all.shape
    F_out = H * F_hid
    assert F_out == F_in, "residual x + c_x requires n_heads*n_hid == n_fea"

    if batch_block is None:
        batch_block = _pick_batch_block(B, N)
    assert B % batch_block == 0
    grid_b = B // batch_block
    tm = batch_block * N
    out_dtype = x.dtype

    # Lane-contiguous 2-D views; (B,N,F) <-> (B*N,F) reshapes are free.
    x2d = x.reshape(B * N, F_in).astype(compute_dtype)
    adj_i8 = (adj > 0).astype(jnp.int8)                  # 4x smaller O(N^2) stream

    # Head-major packed projection matrix and block-diagonal attention matrix
    # (single transpose/reshape + one einsum; no per-head scatter loop).
    w_fused = jnp.transpose(w_all, (1, 0, 2)).reshape(F_in, F_out)
    w_fused = w_fused.astype(compute_dtype)
    a_big = jnp.einsum("gh,htf->gfht", jnp.eye(H, dtype=jnp.float32),
                       a_all.astype(jnp.float32)).reshape(F_out, 2 * H)

    kernel = functools.partial(_multi_gat_kernel, alpha=float(alpha),
                               n_heads=H, f_hid=F_hid, n_nodes=N,
                               batch_block=batch_block)

    # Rough per-step VMEM footprint: double-buffered x/out blocks, single-
    # buffered constants, plus f32 intermediates (h_all, scores, e/p tiles).
    in_size = np.dtype(compute_dtype).itemsize
    out_size = np.dtype(out_dtype).itemsize
    block_bytes = (2 * tm * F_in * in_size + 2 * tm * F_out * out_size
                   + N * N + F_in * F_out * in_size + F_out * 2 * H * 4
                   + tm * (F_in + F_out + 2 * H) * 4 + 4 * N * N * 4)
    vmem_limit = None
    if block_bytes > 32 * 1024 * 1024:
        vmem_limit = min(int(block_bytes * 3 // 2), 128 * 1024 * 1024)

    cost = pl.CostEstimate(
        flops=int(2 * B * N * F_in * F_out + 2 * B * H * N * N * (1 + F_hid)),
        transcendentals=int(B * H * N * N),
        bytes_accessed=int(B * N * F_in * in_size + N * N
                           + F_in * F_out * in_size + F_out * 2 * H * 4
                           + B * N * F_out * out_size),
    )

    # Constant-index operands: never refetched, so single-buffer them.
    const_spec = functools.partial(pl.BlockSpec,
                                   pipeline_mode=pl.Buffered(buffer_count=1))

    out2d = pl.pallas_call(
        kernel,
        out_shape=jax.ShapeDtypeStruct((B * N, F_out), out_dtype),
        grid_spec=pltpu.PrefetchScalarGridSpec(
            num_scalar_prefetch=0,
            grid=(grid_b,),
            in_specs=[
                pl.BlockSpec((tm, F_in), lambda b: (b, 0)),        # x block
                const_spec((N, N), lambda b: (0, 0)),              # adj (int8)
                const_spec((F_in, F_out), lambda b: (0, 0)),       # fused W
                const_spec((F_out, 2 * H), lambda b: (0, 0)),      # fused a
            ],
            out_specs=pl.BlockSpec((tm, F_out), lambda b: (b, 0)),
        ),
        compiler_params=pltpu.CompilerParams(
            dimension_semantics=("parallel",),
            vmem_limit_bytes=vmem_limit),
        cost_estimate=cost,
    )(x2d, adj_i8, w_fused, a_big)

    return out2d.reshape(B, N, F_out)


def _reference(x, adj, w_all, a_all, alpha):
    """Pure-JAX reference mirroring the PyTorch forward (eval mode)."""
    H = w_all.shape[0]
    outs = []
    for h in range(H):
        hh = x @ w_all[h]                                   # (B, N, F_hid)
        s1 = hh @ a_all[h, 0]                               # (B, N)  "j" term
        s2 = hh @ a_all[h, 1]                               # (B, N)  "i" term
        e = s2[..., :, None] + s1[..., None, :]             # (B, N, N)
        e = jnp.where(e > 0, e, alpha * e)
        e = jnp.where(adj[None] > 0, e, jnp.float32(-1e12))
        attn = jax.nn.softmax(e, axis=-1)
        out = attn @ hh
        outs.append(jax.nn.elu(out) + hh)
    return jnp.concatenate(outs, axis=-1) + x


def _xavier_uniform(key, shape, fan_in, fan_out, gain):
    bound = gain * float(np.sqrt(6.0 / (fan_in + fan_out)))
    return jax.random.uniform(key, shape, jnp.float32, -bound, bound)


if __name__ == "__main__":
    # Small shapes consistent with the module: n_fea = n_heads * n_hid.
    # B=4 so the default batch fold picks TB=2 -> grid=(2,) (even, both TCs).
    B, N = 4, 16
    n_heads, n_hid = 4, 8
    n_fea = n_heads * n_hid          # 32
    alpha = 0.2
    gain = 1.414

    key = jax.random.PRNGKey(0)
    kx, kadj, kw, ka = jax.random.split(key, 4)

    x = jax.random.normal(kx, (B, N, n_fea), jnp.float32)

    # Random binary adjacency with self-loops so every softmax row is valid.
    adj = (jax.random.uniform(kadj, (N, N)) > 0.4).astype(jnp.float32)
    adj = jnp.maximum(adj, jnp.eye(N, dtype=jnp.float32))

    # Per-head parameters, matching nn.init.xavier_uniform_ fan computation:
    #   W: (in_fea, out_fea)  -> fan_in=in_fea, fan_out=out_fea
    #   a: (2*out_fea, 1)     -> fan_in=1, fan_out=2*out_fea
    w_all = _xavier_uniform(kw, (n_heads, n_fea, n_hid), n_fea, n_hid, gain)
    a_flat = _xavier_uniform(ka, (n_heads, 2 * n_hid), 1, 2 * n_hid, gain)
    a_all = a_flat.reshape(n_heads, 2, n_hid)   # row 0 = a[:n_hid], row 1 = a[n_hid:]

    ref = _reference(x, adj, w_all, a_all, alpha)

    # f32 path (default; the right choice on v5e).  Tolerance covers the
    # platform-dependent f32 contraction precision (the XLA reference may use
    # bf16-pass matmuls under default precision while the MXU kernel does
    # not); structural bugs show up as O(1) deviations.
    out = jax.block_until_ready(
        multi_gat_forward(x, adj, w_all, a_all, alpha=alpha))
    np.testing.assert_allclose(np.asarray(out), np.asarray(ref),
                               rtol=5e-2, atol=5e-2)

    # bf16 x/W feed (v6e / v7x MXU fast path): loose-tolerance check vs ref.
    out_bf16 = jax.block_until_ready(
        multi_gat_forward(x, adj, w_all, a_all, alpha=alpha,
                          compute_dtype=jnp.bfloat16))
    assert out_bf16.shape == (B, N, n_fea)
    np.testing.assert_allclose(np.asarray(out_bf16, dtype=np.float32),
                               np.asarray(ref), rtol=1e-1, atol=1e-1)

    print("KERNEL_OK")
</pallas_src>

<mosaic_0001>
module attributes {stable_mosaic.version = 11 : i64} {
  func.func @_multi_gat_kernel(%arg0: i32, %arg1: memref<32x32xf32, #tpu.memory_space<vmem>>, %arg2: memref<16x16xi8, #tpu.memory_space<vmem>>, %arg3: memref<32x32xf32, #tpu.memory_space<vmem>>, %arg4: memref<32x8xf32, #tpu.memory_space<vmem>>, %arg5: memref<32x32xf32, #tpu.memory_space<vmem>>) attributes {dimension_semantics = [#tpu.dimension_semantics<parallel>], iteration_bounds = array<i64: 2>, scalar_prefetch = 0 : i64, scratch_operands = 0 : i64, tpu.core_type = #tpu.core_type<tc>, window_params = [{transform_indices = @transform_0, window_bounds = array<i64: 32, 32>}, {pipeline_mode = #tpu.pipeline_mode<synchronous>, transform_indices = @transform_1, window_bounds = array<i64: 16, 16>}, {pipeline_mode = #tpu.pipeline_mode<synchronous>, transform_indices = @transform_2, window_bounds = array<i64: 32, 32>}, {pipeline_mode = #tpu.pipeline_mode<synchronous>, transform_indices = @transform_3, window_bounds = array<i64: 32, 8>}, {transform_indices = @transform_4, window_bounds = array<i64: 32, 32>}]} {
    %c0 = arith.constant 0 : index
    %c0_0 = arith.constant 0 : index
    %0 = vector.load %arg1[%c0, %c0_0] : memref<32x32xf32, #tpu.memory_space<vmem>>, vector<32x32xf32>
    %c0_1 = arith.constant 0 : index
    %c0_2 = arith.constant 0 : index
    %1 = vector.load %arg3[%c0_1, %c0_2] : memref<32x32xf32, #tpu.memory_space<vmem>>, vector<32x32xf32>
    %cst = arith.constant dense<0.000000e+00> : vector<32x32xf32>
    %2 = tpu.matmul %0, %1, %cst {dimension_numbers = #tpu.dot_dimension_numbers<[1], [0], [0], [1], [0, 0, 1, 1], [], []>} : vector<32x32xf32>, vector<32x32xf32>, vector<32x32xf32> -> vector<32x32xf32>
    %c0_3 = arith.constant 0 : index
    %c0_4 = arith.constant 0 : index
    %3 = vector.load %arg4[%c0_3, %c0_4] : memref<32x8xf32, #tpu.memory_space<vmem>>, vector<32x8xf32>
    %cst_5 = arith.constant dense<0.000000e+00> : vector<32x8xf32>
    %4 = tpu.matmul %2, %3, %cst_5 {dimension_numbers = #tpu.dot_dimension_numbers<[1], [0], [0], [1], [0, 0, 1, 1], [], []>} : vector<32x32xf32>, vector<32x8xf32>, vector<32x8xf32> -> vector<32x8xf32>
    %5 = tpu.transpose %4, [1, 0] : vector<32x8xf32> -> vector<8x32xf32>
    %c0_6 = arith.constant 0 : index
    %c0_7 = arith.constant 0 : index
    %6 = vector.load %arg2[%c0_6, %c0_7] : memref<16x16xi8, #tpu.memory_space<vmem>>, vector<16x16xi8>
    %7 = arith.sitofp %6 : vector<16x16xi8> to vector<16x16xf32>
    %cst_8 = arith.constant 0.000000e+00 : f32
    %8 = vector.broadcast %cst_8 : f32 to vector<16x16xf32>
    %9 = arith.cmpf ogt, %7, %8 : vector<16x16xf32>
    %10 = vector.extract_strided_slice %2 {offsets = [0, 0], sizes = [16, 32], strides = [1, 1]} : vector<32x32xf32> to vector<16x32xf32>
    %11 = vector.extract_strided_slice %0 {offsets = [0, 0], sizes = [16, 32], strides = [1, 1]} : vector<32x32xf32> to vector<16x32xf32>
    %12 = vector.extract_strided_slice %10 {offsets = [0, 0], sizes = [16, 8], strides = [1, 1]} : vector<16x32xf32> to vector<16x8xf32>
    %13 = vector.extract_strided_slice %5 {offsets = [0, 0], sizes = [1, 16], strides = [1, 1]} : vector<8x32xf32> to vector<1x16xf32>
    %14 = vector.extract_strided_slice %4 {offsets = [0, 1], sizes = [16, 1], strides = [1, 1]} : vector<32x8xf32> to vector<16x1xf32>
    %15 = vector.broadcast %14 : vector<16x1xf32> to vector<16x16xf32>
    %16 = vector.broadcast %13 : vector<1x16xf32> to vector<16x16xf32>
    %17 = arith.addf %15, %16 : vector<16x16xf32>
    %cst_9 = arith.constant 0.000000e+00 : f32
    %18 = vector.broadcast %cst_9 : f32 to vector<16x16xf32>
    %19 = arith.cmpf ogt, %17, %18 : vector<16x16xf32>
    %cst_10 = arith.constant 2.000000e-01 : f32
    %20 = vector.broadcast %cst_10 : f32 to vector<16x16xf32>
    %21 = arith.mulf %20, %17 : vector<16x16xf32>
    %22 = arith.select %19, %17, %21 : vector<16x16xi1>, vector<16x16xf32>
    %cst_11 = arith.constant -9.99999995E+11 : f32
    %23 = vector.broadcast %cst_11 : f32 to vector<16x16xf32>
    %24 = arith.select %9, %22, %23 : vector<16x16xi1>, vector<16x16xf32>
    %cst_12 = arith.constant dense<0xFF800000> : vector<16xf32>
    %25 = vector.multi_reduction <maximumf>, %24, %cst_12 [1] : vector<16x16xf32> to vector<16xf32>
    %26 = vector.shape_cast %25 : vector<16xf32> to vector<16x1xf32>
    %27 = vector.broadcast %26 : vector<16x1xf32> to vector<16x16xf32>
    %28 = arith.subf %24, %27 : vector<16x16xf32>
    %29 = math.exp %28 : vector<16x16xf32>
    %cst_13 = arith.constant dense<0.000000e+00> : vector<16xf32>
    %30 = vector.multi_reduction <add>, %29, %cst_13 [1] : vector<16x16xf32> to vector<16xf32>
    %31 = vector.shape_cast %30 : vector<16xf32> to vector<16x1xf32>
    %32 = tpu.reciprocal %31 {approx = true} : vector<16x1xf32> -> vector<16x1xf32>
    %33 = arith.mulf %31, %32 : vector<16x1xf32>
    %cst_14 = arith.constant 2.000000e+00 : f32
    %34 = vector.broadcast %cst_14 : f32 to vector<16x1xf32>
    %35 = arith.subf %34, %33 : vector<16x1xf32>
    %36 = arith.mulf %32, %35 : vector<16x1xf32>
    %37 = vector.broadcast %36 : vector<16x1xf32> to vector<16x16xf32>
    %38 = arith.mulf %29, %37 : vector<16x16xf32>
    %cst_15 = arith.constant dense<0.000000e+00> : vector<16x8xf32>
    %39 = tpu.matmul %38, %12, %cst_15 {dimension_numbers = #tpu.dot_dimension_numbers<[1], [0], [0], [1], [0, 0, 1, 1], [], []>} : vector<16x16xf32>, vector<16x8xf32>, vector<16x8xf32> -> vector<16x8xf32>
    %cst_16 = arith.constant 0.000000e+00 : f32
    %40 = vector.broadcast %cst_16 : f32 to vector<16x8xf32>
    %41 = arith.cmpf ogt, %39, %40 : vector<16x8xf32>
    %cst_17 = arith.constant 0.000000e+00 : f32
    %42 = vector.broadcast %cst_17 : f32 to vector<16x8xf32>
    %43 = arith.minimumf %39, %42 : vector<16x8xf32>
    %44 = math.exp %43 : vector<16x8xf32>
    %cst_18 = arith.constant 1.000000e+00 : f32
    %45 = vector.broadcast %cst_18 : f32 to vector<16x8xf32>
    %46 = arith.subf %44, %45 : vector<16x8xf32>
    %47 = arith.select %41, %39, %46 : vector<16x8xi1>, vector<16x8xf32>
    %48 = arith.addf %47, %12 : vector<16x8xf32>
    %49 = vector.extract_strided_slice %11 {offsets = [0, 0], sizes = [16, 8], strides = [1, 1]} : vector<16x32xf32> to vector<16x8xf32>
    %50 = arith.addf %48, %49 : vector<16x8xf32>
    %c0_19 = arith.constant 0 : index
    %c0_20 = arith.constant 0 : index
    %51 = vector.load %arg5[%c0_19, %c0_20] : memref<32x32xf32, #tpu.memory_space<vmem>>, vector<16x8xf32>
    tpu.vector_store %arg5[%c0_19, %c0_20], %50 {strides = array<i32>} : memref<32x32xf32, #tpu.memory_space<vmem>>, vector<16x8xf32>,
    %52 = vector.extract_strided_slice %10 {offsets = [0, 8], sizes = [16, 8], strides = [1, 1]} : vector<16x32xf32> to vector<16x8xf32>
    %53 = vector.extract_strided_slice %5 {offsets = [2, 0], sizes = [1, 16], strides = [1, 1]} : vector<8x32xf32> to vector<1x16xf32>
    %54 = vector.extract_strided_slice %4 {offsets = [0, 3], sizes = [16, 1], strides = [1, 1]} : vector<32x8xf32> to vector<16x1xf32>
    %55 = vector.broadcast %54 : vector<16x1xf32> to vector<16x16xf32>
    %56 = vector.broadcast %53 : vector<1x16xf32> to vector<16x16xf32>
    %57 = arith.addf %55, %56 : vector<16x16xf32>
    %cst_21 = arith.constant 0.000000e+00 : f32
    %58 = vector.broadcast %cst_21 : f32 to vector<16x16xf32>
    %59 = arith.cmpf ogt, %57, %58 : vector<16x16xf32>
    %cst_22 = arith.constant 2.000000e-01 : f32
    %60 = vector.broadcast %cst_22 : f32 to vector<16x16xf32>
    %61 = arith.mulf %60, %57 : vector<16x16xf32>
    %62 = arith.select %59, %57, %61 : vector<16x16xi1>, vector<16x16xf32>
    %cst_23 = arith.constant -9.99999995E+11 : f32
    %63 = vector.broadcast %cst_23 : f32 to vector<16x16xf32>
    %64 = arith.select %9, %62, %63 : vector<16x16xi1>, vector<16x16xf32>
    %cst_24 = arith.constant dense<0xFF800000> : vector<16xf32>
    %65 = vector.multi_reduction <maximumf>, %64, %cst_24 [1] : vector<16x16xf32> to vector<16xf32>
    %66 = vector.shape_cast %65 : vector<16xf32> to vector<16x1xf32>
    %67 = vector.broadcast %66 : vector<16x1xf32> to vector<16x16xf32>
    %68 = arith.subf %64, %67 : vector<16x16xf32>
    %69 = math.exp %68 : vector<16x16xf32>
    %cst_25 = arith.constant dense<0.000000e+00> : vector<16xf32>
    %70 = vector.multi_reduction <add>, %69, %cst_25 [1] : vector<16x16xf32> to vector<16xf32>
    %71 = vector.shape_cast %70 : vector<16xf32> to vector<16x1xf32>
    %72 = tpu.reciprocal %71 {approx = true} : vector<16x1xf32> -> vector<16x1xf32>
    %73 = arith.mulf %71, %72 : vector<16x1xf32>
    %cst_26 = arith.constant 2.000000e+00 : f32
    %74 = vector.broadcast %cst_26 : f32 to vector<16x1xf32>
    %75 = arith.subf %74, %73 : vector<16x1xf32>
    %76 = arith.mulf %72, %75 : vector<16x1xf32>
    %77 = vector.broadcast %76 : vector<16x1xf32> to vector<16x16xf32>
    %78 = arith.mulf %69, %77 : vector<16x16xf32>
    %cst_27 = arith.constant dense<0.000000e+00> : vector<16x8xf32>
    %79 = tpu.matmul %78, %52, %cst_27 {dimension_numbers = #tpu.dot_dimension_numbers<[1], [0], [0], [1], [0, 0, 1, 1], [], []>} : vector<16x16xf32>, vector<16x8xf32>, vector<16x8xf32> -> vector<16x8xf32>
    %cst_28 = arith.constant 0.000000e+00 : f32
    %80 = vector.broadcast %cst_28 : f32 to vector<16x8xf32>
    %81 = arith.cmpf ogt, %79, %80 : vector<16x8xf32>
    %cst_29 = arith.constant 0.000000e+00 : f32
    %82 = vector.broadcast %cst_29 : f32 to vector<16x8xf32>
    %83 = arith.minimumf %79, %82 : vector<16x8xf32>
    %84 = math.exp %83 : vector<16x8xf32>
    %cst_30 = arith.constant 1.000000e+00 : f32
    %85 = vector.broadcast %cst_30 : f32 to vector<16x8xf32>
    %86 = arith.subf %84, %85 : vector<16x8xf32>
    %87 = arith.select %81, %79, %86 : vector<16x8xi1>, vector<16x8xf32>
    %88 = arith.addf %87, %52 : vector<16x8xf32>
    %89 = vector.extract_strided_slice %11 {offsets = [0, 8], sizes = [16, 8], strides = [1, 1]} : vector<16x32xf32> to vector<16x8xf32>
    %90 = arith.addf %88, %89 : vector<16x8xf32>
    %c0_31 = arith.constant 0 : index
    %c8 = arith.constant 8 : index
    %91 = vector.load %arg5[%c0_31, %c8] : memref<32x32xf32, #tpu.memory_space<vmem>>, vector<16x8xf32>
    tpu.vector_store %arg5[%c0_31, %c8], %90 {strides = array<i32>} : memref<32x32xf32, #tpu.memory_space<vmem>>, vector<16x8xf32>,
    %92 = vector.extract_strided_slice %10 {offsets = [0, 16], sizes = [16, 8], strides = [1, 1]} : vector<16x32xf32> to vector<16x8xf32>
    %93 = vector.extract_strided_slice %5 {offsets = [4, 0], sizes = [1, 16], strides = [1, 1]} : vector<8x32xf32> to vector<1x16xf32>
    %94 = vector.extract_strided_slice %4 {offsets = [0, 5], sizes = [16, 1], strides = [1, 1]} : vector<32x8xf32> to vector<16x1xf32>
    %95 = vector.broadcast %94 : vector<16x1xf32> to vector<16x16xf32>
    %96 = vector.broadcast %93 : vector<1x16xf32> to vector<16x16xf32>
    %97 = arith.addf %95, %96 : vector<16x16xf32>
    %cst_32 = arith.constant 0.000000e+00 : f32
    %98 = vector.broadcast %cst_32 : f32 to vector<16x16xf32>
    %99 = arith.cmpf ogt, %97, %98 : vector<16x16xf32>
    %cst_33 = arith.constant 2.000000e-01 : f32
    %100 = vector.broadcast %cst_33 : f32 to vector<16x16xf32>
    %101 = arith.mulf %100, %97 : vector<16x16xf32>
    %102 = arith.select %99, %97, %101 : vector<16x16xi1>, vector<16x16xf32>
    %cst_34 = arith.constant -9.99999995E+11 : f32
    %103 = vector.broadcast %cst_34 : f32 to vector<16x16xf32>
    %104 = arith.select %9, %102, %103 : vector<16x16xi1>, vector<16x16xf32>
    %cst_35 = arith.constant dense<0xFF800000> : vector<16xf32>
    %105 = vector.multi_reduction <maximumf>, %104, %cst_35 [1] : vector<16x16xf32> to vector<16xf32>
    %106 = vector.shape_cast %105 : vector<16xf32> to vector<16x1xf32>
    %107 = vector.broadcast %106 : vector<16x1xf32> to vector<16x16xf32>
    %108 = arith.subf %104, %107 : vector<16x16xf32>
    %109 = math.exp %108 : vector<16x16xf32>
    %cst_36 = arith.constant dense<0.000000e+00> : vector<16xf32>
    %110 = vector.multi_reduction <add>, %109, %cst_36 [1] : vector<16x16xf32> to vector<16xf32>
    %111 = vector.shape_cast %110 : vector<16xf32> to vector<16x1xf32>
    %112 = tpu.reciprocal %111 {approx = true} : vector<16x1xf32> -> vector<16x1xf32>
    %113 = arith.mulf %111, %112 : vector<16x1xf32>
    %cst_37 = arith.constant 2.000000e+00 : f32
    %114 = vector.broadcast %cst_37 : f32 to vector<16x1xf32>
    %115 = arith.subf %114, %113 : vector<16x1xf32>
    %116 = arith.mulf %112, %115 : vector<16x1xf32>
    %117 = vector.broadcast %116 : vector<16x1xf32> to vector<16x16xf32>
    %118 = arith.mulf %109, %117 : vector<16x16xf32>
    %cst_38 = arith.constant dense<0.000000e+00> : vector<16x8xf32>
    %119 = tpu.matmul %118, %92, %cst_38 {dimension_numbers = #tpu.dot_dimension_numbers<[1], [0], [0], [1], [0, 0, 1, 1], [], []>} : vector<16x16xf32>, vector<16x8xf32>, vector<16x8xf32> -> vector<16x8xf32>
    %cst_39 = arith.constant 0.000000e+00 : f32
    %120 = vector.broadcast %cst_39 : f32 to vector<16x8xf32>
    %121 = arith.cmpf ogt, %119, %120 : vector<16x8xf32>
    %cst_40 = arith.constant 0.000000e+00 : f32
    %122 = vector.broadcast %cst_40 : f32 to vector<16x8xf32>
    %123 = arith.minimumf %119, %122 : vector<16x8xf32>
    %124 = math.exp %123 : vector<16x8xf32>
    %cst_41 = arith.constant 1.000000e+00 : f32
    %125 = vector.broadcast %cst_41 : f32 to vector<16x8xf32>
    %126 = arith.subf %124, %125 : vector<16x8xf32>
    %127 = arith.select %121, %119, %126 : vector<16x8xi1>, vector<16x8xf32>
    %128 = arith.addf %127, %92 : vector<16x8xf32>
    %129 = vector.extract_strided_slice %11 {offsets = [0, 16], sizes = [16, 8], strides = [1, 1]} : vector<16x32xf32> to vector<16x8xf32>
    %130 = arith.addf %128, %129 : vector<16x8xf32>
    %c0_42 = arith.constant 0 : index
    %c16 = arith.constant 16 : index
    %131 = vector.load %arg5[%c0_42, %c16] : memref<32x32xf32, #tpu.memory_space<vmem>>, vector<16x8xf32>
    tpu.vector_store %arg5[%c0_42, %c16], %130 {strides = array<i32>} : memref<32x32xf32, #tpu.memory_space<vmem>>, vector<16x8xf32>,
    %132 = vector.extract_strided_slice %10 {offsets = [0, 24], sizes = [16, 8], strides = [1, 1]} : vector<16x32xf32> to vector<16x8xf32>
    %133 = vector.extract_strided_slice %5 {offsets = [6, 0], sizes = [1, 16], strides = [1, 1]} : vector<8x32xf32> to vector<1x16xf32>
    %134 = vector.extract_strided_slice %4 {offsets = [0, 7], sizes = [16, 1], strides = [1, 1]} : vector<32x8xf32> to vector<16x1xf32>
    %135 = vector.broadcast %134 : vector<16x1xf32> to vector<16x16xf32>
    %136 = vector.broadcast %133 : vector<1x16xf32> to vector<16x16xf32>
    %137 = arith.addf %135, %136 : vector<16x16xf32>
    %cst_43 = arith.constant 0.000000e+00 : f32
    %138 = vector.broadcast %cst_43 : f32 to vector<16x16xf32>
    %139 = arith.cmpf ogt, %137, %138 : vector<16x16xf32>
    %cst_44 = arith.constant 2.000000e-01 : f32
    %140 = vector.broadcast %cst_44 : f32 to vector<16x16xf32>
    %141 = arith.mulf %140, %137 : vector<16x16xf32>
    %142 = arith.select %139, %137, %141 : vector<16x16xi1>, vector<16x16xf32>
    %cst_45 = arith.constant -9.99999995E+11 : f32
    %143 = vector.broadcast %cst_45 : f32 to vector<16x16xf32>
    %144 = arith.select %9, %142, %143 : vector<16x16xi1>, vector<16x16xf32>
    %cst_46 = arith.constant dense<0xFF800000> : vector<16xf32>
    %145 = vector.multi_reduction <maximumf>, %144, %cst_46 [1] : vector<16x16xf32> to vector<16xf32>
    %146 = vector.shape_cast %145 : vector<16xf32> to vector<16x1xf32>
    %147 = vector.broadcast %146 : vector<16x1xf32> to vector<16x16xf32>
    %148 = arith.subf %144, %147 : vector<16x16xf32>
    %149 = math.exp %148 : vector<16x16xf32>
    %cst_47 = arith.constant dense<0.000000e+00> : vector<16xf32>
    %150 = vector.multi_reduction <add>, %149, %cst_47 [1] : vector<16x16xf32> to vector<16xf32>
    %151 = vector.shape_cast %150 : vector<16xf32> to vector<16x1xf32>
    %152 = tpu.reciprocal %151 {approx = true} : vector<16x1xf32> -> vector<16x1xf32>
    %153 = arith.mulf %151, %152 : vector<16x1xf32>
    %cst_48 = arith.constant 2.000000e+00 : f32
    %154 = vector.broadcast %cst_48 : f32 to vector<16x1xf32>
    %155 = arith.subf %154, %153 : vector<16x1xf32>
    %156 = arith.mulf %152, %155 : vector<16x1xf32>
    %157 = vector.broadcast %156 : vector<16x1xf32> to vector<16x16xf32>
    %158 = arith.mulf %149, %157 : vector<16x16xf32>
    %cst_49 = arith.constant dense<0.000000e+00> : vector<16x8xf32>
    %159 = tpu.matmul %158, %132, %cst_49 {dimension_numbers = #tpu.dot_dimension_numbers<[1], [0], [0], [1], [0, 0, 1, 1], [], []>} : vector<16x16xf32>, vector<16x8xf32>, vector<16x8xf32> -> vector<16x8xf32>
    %cst_50 = arith.constant 0.000000e+00 : f32
    %160 = vector.broadcast %cst_50 : f32 to vector<16x8xf32>
    %161 = arith.cmpf ogt, %159, %160 : vector<16x8xf32>
    %cst_51 = arith.constant 0.000000e+00 : f32
    %162 = vector.broadcast %cst_51 : f32 to vector<16x8xf32>
    %163 = arith.minimumf %159, %162 : vector<16x8xf32>
    %164 = math.exp %163 : vector<16x8xf32>
    %cst_52 = arith.constant 1.000000e+00 : f32
    %165 = vector.broadcast %cst_52 : f32 to vector<16x8xf32>
    %166 = arith.subf %164, %165 : vector<16x8xf32>
    %167 = arith.select %161, %159, %166 : vector<16x8xi1>, vector<16x8xf32>
    %168 = arith.addf %167, %132 : vector<16x8xf32>
    %169 = vector.extract_strided_slice %11 {offsets = [0, 24], sizes = [16, 8], strides = [1, 1]} : vector<16x32xf32> to vector<16x8xf32>
    %170 = arith.addf %168, %169 : vector<16x8xf32>
    %c0_53 = arith.constant 0 : index
    %c24 = arith.constant 24 : index
    %171 = vector.load %arg5[%c0_53, %c24] : memref<32x32xf32, #tpu.memory_space<vmem>>, vector<16x8xf32>
    tpu.vector_store %arg5[%c0_53, %c24], %170 {strides = array<i32>} : memref<32x32xf32, #tpu.memory_space<vmem>>, vector<16x8xf32>,
    %172 = vector.extract_strided_slice %2 {offsets = [16, 0], sizes = [16, 32], strides = [1, 1]} : vector<32x32xf32> to vector<16x32xf32>
    %173 = vector.extract_strided_slice %0 {offsets = [16, 0], sizes = [16, 32], strides = [1, 1]} : vector<32x32xf32> to vector<16x32xf32>
    %174 = vector.extract_strided_slice %172 {offsets = [0, 0], sizes = [16, 8], strides = [1, 1]} : vector<16x32xf32> to vector<16x8xf32>
    %175 = vector.extract_strided_slice %5 {offsets = [0, 16], sizes = [1, 16], strides = [1, 1]} : vector<8x32xf32> to vector<1x16xf32>
    %176 = vector.extract_strided_slice %4 {offsets = [16, 1], sizes = [16, 1], strides = [1, 1]} : vector<32x8xf32> to vector<16x1xf32>
    %177 = vector.broadcast %176 : vector<16x1xf32> to vector<16x16xf32>
    %178 = vector.broadcast %175 : vector<1x16xf32> to vector<16x16xf32>
    %179 = arith.addf %177, %178 : vector<16x16xf32>
    %cst_54 = arith.constant 0.000000e+00 : f32
    %180 = vector.broadcast %cst_54 : f32 to vector<16x16xf32>
    %181 = arith.cmpf ogt, %179, %180 : vector<16x16xf32>
    %cst_55 = arith.constant 2.000000e-01 : f32
    %182 = vector.broadcast %cst_55 : f32 to vector<16x16xf32>
    %183 = arith.mulf %182, %179 : vector<16x16xf32>
    %184 = arith.select %181, %179, %183 : vector<16x16xi1>, vector<16x16xf32>
    %cst_56 = arith.constant -9.99999995E+11 : f32
    %185 = vector.broadcast %cst_56 : f32 to vector<16x16xf32>
    %186 = arith.select %9, %184, %185 : vector<16x16xi1>, vector<16x16xf32>
    %cst_57 = arith.constant dense<0xFF800000> : vector<16xf32>
    %187 = vector.multi_reduction <maximumf>, %186, %cst_57 [1] : vector<16x16xf32> to vector<16xf32>
    %188 = vector.shape_cast %187 : vector<16xf32> to vector<16x1xf32>
    %189 = vector.broadcast %188 : vector<16x1xf32> to vector<16x16xf32>
    %190 = arith.subf %186, %189 : vector<16x16xf32>
    %191 = math.exp %190 : vector<16x16xf32>
    %cst_58 = arith.constant dense<0.000000e+00> : vector<16xf32>
    %192 = vector.multi_reduction <add>, %191, %cst_58 [1] : vector<16x16xf32> to vector<16xf32>
    %193 = vector.shape_cast %192 : vector<16xf32> to vector<16x1xf32>
    %194 = tpu.reciprocal %193 {approx = true} : vector<16x1xf32> -> vector<16x1xf32>
    %195 = arith.mulf %193, %194 : vector<16x1xf32>
    %cst_59 = arith.constant 2.000000e+00 : f32
    %196 = vector.broadcast %cst_59 : f32 to vector<16x1xf32>
    %197 = arith.subf %196, %195 : vector<16x1xf32>
    %198 = arith.mulf %194, %197 : vector<16x1xf32>
    %199 = vector.broadcast %198 : vector<16x1xf32> to vector<16x16xf32>
    %200 = arith.mulf %191, %199 : vector<16x16xf32>
    %cst_60 = arith.constant dense<0.000000e+00> : vector<16x8xf32>
    %201 = tpu.matmul %200, %174, %cst_60 {dimension_numbers = #tpu.dot_dimension_numbers<[1], [0], [0], [1], [0, 0, 1, 1], [], []>} : vector<16x16xf32>, vector<16x8xf32>, vector<16x8xf32> -> vector<16x8xf32>
    %cst_61 = arith.constant 0.000000e+00 : f32
    %202 = vector.broadcast %cst_61 : f32 to vector<16x8xf32>
    %203 = arith.cmpf ogt, %201, %202 : vector<16x8xf32>
    %cst_62 = arith.constant 0.000000e+00 : f32
    %204 = vector.broadcast %cst_62 : f32 to vector<16x8xf32>
    %205 = arith.minimumf %201, %204 : vector<16x8xf32>
    %206 = math.exp %205 : vector<16x8xf32>
    %cst_63 = arith.constant 1.000000e+00 : f32
    %207 = vector.broadcast %cst_63 : f32 to vector<16x8xf32>
    %208 = arith.subf %206, %207 : vector<16x8xf32>
    %209 = arith.select %203, %201, %208 : vector<16x8xi1>, vector<16x8xf32>
    %210 = arith.addf %209, %174 : vector<16x8xf32>
    %211 = vector.extract_strided_slice %173 {offsets = [0, 0], sizes = [16, 8], strides = [1, 1]} : vector<16x32xf32> to vector<16x8xf32>
    %212 = arith.addf %210, %211 : vector<16x8xf32>
    %c16_64 = arith.constant 16 : index
    %c0_65 = arith.constant 0 : index
    %213 = vector.load %arg5[%c16_64, %c0_65] : memref<32x32xf32, #tpu.memory_space<vmem>>, vector<16x8xf32>
    tpu.vector_store %arg5[%c16_64, %c0_65], %212 {strides = array<i32>} : memref<32x32xf32, #tpu.memory_space<vmem>>, vector<16x8xf32>,
    %214 = vector.extract_strided_slice %172 {offsets = [0, 8], sizes = [16, 8], strides = [1, 1]} : vector<16x32xf32> to vector<16x8xf32>
    %215 = vector.extract_strided_slice %5 {offsets = [2, 16], sizes = [1, 16], strides = [1, 1]} : vector<8x32xf32> to vector<1x16xf32>
    %216 = vector.extract_strided_slice %4 {offsets = [16, 3], sizes = [16, 1], strides = [1, 1]} : vector<32x8xf32> to vector<16x1xf32>
    %217 = vector.broadcast %216 : vector<16x1xf32> to vector<16x16xf32>
    %218 = vector.broadcast %215 : vector<1x16xf32> to vector<16x16xf32>
    %219 = arith.addf %217, %218 : vector<16x16xf32>
    %cst_66 = arith.constant 0.000000e+00 : f32
    %220 = vector.broadcast %cst_66 : f32 to vector<16x16xf32>
    %221 = arith.cmpf ogt, %219, %220 : vector<16x16xf32>
    %cst_67 = arith.constant 2.000000e-01 : f32
    %222 = vector.broadcast %cst_67 : f32 to vector<16x16xf32>
    %223 = arith.mulf %222, %219 : vector<16x16xf32>
    %224 = arith.select %221, %219, %223 : vector<16x16xi1>, vector<16x16xf32>
    %cst_68 = arith.constant -9.99999995E+11 : f32
    %225 = vector.broadcast %cst_68 : f32 to vector<16x16xf32>
    %226 = arith.select %9, %224, %225 : vector<16x16xi1>, vector<16x16xf32>
    %cst_69 = arith.constant dense<0xFF800000> : vector<16xf32>
    %227 = vector.multi_reduction <maximumf>, %226, %cst_69 [1] : vector<16x16xf32> to vector<16xf32>
    %228 = vector.shape_cast %227 : vector<16xf32> to vector<16x1xf32>
    %229 = vector.broadcast %228 : vector<16x1xf32> to vector<16x16xf32>
    %230 = arith.subf %226, %229 : vector<16x16xf32>
    %231 = math.exp %230 : vector<16x16xf32>
    %cst_70 = arith.constant dense<0.000000e+00> : vector<16xf32>
    %232 = vector.multi_reduction <add>, %231, %cst_70 [1] : vector<16x16xf32> to vector<16xf32>
    %233 = vector.shape_cast %232 : vector<16xf32> to vector<16x1xf32>
    %234 = tpu.reciprocal %233 {approx = true} : vector<16x1xf32> -> vector<16x1xf32>
    %235 = arith.mulf %233, %234 : vector<16x1xf32>
    %cst_71 = arith.constant 2.000000e+00 : f32
    %236 = vector.broadcast %cst_71 : f32 to vector<16x1xf32>
    %237 = arith.subf %236, %235 : vector<16x1xf32>
    %238 = arith.mulf %234, %237 : vector<16x1xf32>
    %239 = vector.broadcast %238 : vector<16x1xf32> to vector<16x16xf32>
    %240 = arith.mulf %231, %239 : vector<16x16xf32>
    %cst_72 = arith.constant dense<0.000000e+00> : vector<16x8xf32>
    %241 = tpu.matmul %240, %214, %cst_72 {dimension_numbers = #tpu.dot_dimension_numbers<[1], [0], [0], [1], [0, 0, 1, 1], [], []>} : vector<16x16xf32>, vector<16x8xf32>, vector<16x8xf32> -> vector<16x8xf32>
    %cst_73 = arith.constant 0.000000e+00 : f32
    %242 = vector.broadcast %cst_73 : f32 to vector<16x8xf32>
    %243 = arith.cmpf ogt, %241, %242 : vector<16x8xf32>
    %cst_74 = arith.constant 0.000000e+00 : f32
    %244 = vector.broadcast %cst_74 : f32 to vector<16x8xf32>
    %245 = arith.minimumf %241, %244 : vector<16x8xf32>
    %246 = math.exp %245 : vector<16x8xf32>
    %cst_75 = arith.constant 1.000000e+00 : f32
    %247 = vector.broadcast %cst_75 : f32 to vector<16x8xf32>
    %248 = arith.subf %246, %247 : vector<16x8xf32>
    %249 = arith.select %243, %241, %248 : vector<16x8xi1>, vector<16x8xf32>
    %250 = arith.addf %249, %214 : vector<16x8xf32>
    %251 = vector.extract_strided_slice %173 {offsets = [0, 8], sizes = [16, 8], strides = [1, 1]} : vector<16x32xf32> to vector<16x8xf32>
    %252 = arith.addf %250, %251 : vector<16x8xf32>
    %c16_76 = arith.constant 16 : index
    %c8_77 = arith.constant 8 : index
    %253 = vector.load %arg5[%c16_76, %c8_77] : memref<32x32xf32, #tpu.memory_space<vmem>>, vector<16x8xf32>
    tpu.vector_store %arg5[%c16_76, %c8_77], %252 {strides = array<i32>} : memref<32x32xf32, #tpu.memory_space<vmem>>, vector<16x8xf32>,
    %254 = vector.extract_strided_slice %172 {offsets = [0, 16], sizes = [16, 8], strides = [1, 1]} : vector<16x32xf32> to vector<16x8xf32>
    %255 = vector.extract_strided_slice %5 {offsets = [4, 16], sizes = [1, 16], strides = [1, 1]} : vector<8x32xf32> to vector<1x16xf32>
    %256 = vector.extract_strided_slice %4 {offsets = [16, 5], sizes = [16, 1], strides = [1, 1]} : vector<32x8xf32> to vector<16x1xf32>
    %257 = vector.broadcast %256 : vector<16x1xf32> to vector<16x16xf32>
    %258 = vector.broadcast %255 : vector<1x16xf32> to vector<16x16xf32>
    %259 = arith.addf %257, %258 : vector<16x16xf32>
    %cst_78 = arith.constant 0.000000e+00 : f32
    %260 = vector.broadcast %cst_78 : f32 to vector<16x16xf32>
    %261 = arith.cmpf ogt, %259, %260 : vector<16x16xf32>
    %cst_79 = arith.constant 2.000000e-01 : f32
    %262 = vector.broadcast %cst_79 : f32 to vector<16x16xf32>
    %263 = arith.mulf %262, %259 : vector<16x16xf32>
    %264 = arith.select %261, %259, %263 : vector<16x16xi1>, vector<16x16xf32>
    %cst_80 = arith.constant -9.99999995E+11 : f32
    %265 = vector.broadcast %cst_80 : f32 to vector<16x16xf32>
    %266 = arith.select %9, %264, %265 : vector<16x16xi1>, vector<16x16xf32>
    %cst_81 = arith.constant dense<0xFF800000> : vector<16xf32>
    %267 = vector.multi_reduction <maximumf>, %266, %cst_81 [1] : vector<16x16xf32> to vector<16xf32>
    %268 = vector.shape_cast %267 : vector<16xf32> to vector<16x1xf32>
    %269 = vector.broadcast %268 : vector<16x1xf32> to vector<16x16xf32>
    %270 = arith.subf %266, %269 : vector<16x16xf32>
    %271 = math.exp %270 : vector<16x16xf32>
    %cst_82 = arith.constant dense<0.000000e+00> : vector<16xf32>
    %272 = vector.multi_reduction <add>, %271, %cst_82 [1] : vector<16x16xf32> to vector<16xf32>
    %273 = vector.shape_cast %272 : vector<16xf32> to vector<16x1xf32>
    %274 = tpu.reciprocal %273 {approx = true} : vector<16x1xf32> -> vector<16x1xf32>
    %275 = arith.mulf %273, %274 : vector<16x1xf32>
    %cst_83 = arith.constant 2.000000e+00 : f32
    %276 = vector.broadcast %cst_83 : f32 to vector<16x1xf32>
    %277 = arith.subf %276, %275 : vector<16x1xf32>
    %278 = arith.mulf %274, %277 : vector<16x1xf32>
    %279 = vector.broadcast %278 : vector<16x1xf32> to vector<16x16xf32>
    %280 = arith.mulf %271, %279 : vector<16x16xf32>
    %cst_84 = arith.constant dense<0.000000e+00> : vector<16x8xf32>
    %281 = tpu.matmul %280, %254, %cst_84 {dimension_numbers = #tpu.dot_dimension_numbers<[1], [0], [0], [1], [0, 0, 1, 1], [], []>} : vector<16x16xf32>, vector<16x8xf32>, vector<16x8xf32> -> vector<16x8xf32>
    %cst_85 = arith.constant 0.000000e+00 : f32
    %282 = vector.broadcast %cst_85 : f32 to vector<16x8xf32>
    %283 = arith.cmpf ogt, %281, %282 : vector<16x8xf32>
    %cst_86 = arith.constant 0.000000e+00 : f32
    %284 = vector.broadcast %cst_86 : f32 to vector<16x8xf32>
    %285 = arith.minimumf %281, %284 : vector<16x8xf32>
    %286 = math.exp %285 : vector<16x8xf32>
    %cst_87 = arith.constant 1.000000e+00 : f32
    %287 = vector.broadcast %cst_87 : f32 to vector<16x8xf32>
    %288 = arith.subf %286, %287 : vector<16x8xf32>
    %289 = arith.select %283, %281, %288 : vector<16x8xi1>, vector<16x8xf32>
    %290 = arith.addf %289, %254 : vector<16x8xf32>
    %291 = vector.extract_strided_slice %173 {offsets = [0, 16], sizes = [16, 8], strides = [1, 1]} : vector<16x32xf32> to vector<16x8xf32>
    %292 = arith.addf %290, %291 : vector<16x8xf32>
    %c16_88 = arith.constant 16 : index
    %c16_89 = arith.constant 16 : index
    %293 = vector.load %arg5[%c16_88, %c16_89] : memref<32x32xf32, #tpu.memory_space<vmem>>, vector<16x8xf32>
    tpu.vector_store %arg5[%c16_88, %c16_89], %292 {strides = array<i32>} : memref<32x32xf32, #tpu.memory_space<vmem>>, vector<16x8xf32>,
    %294 = vector.extract_strided_slice %172 {offsets = [0, 24], sizes = [16, 8], strides = [1, 1]} : vector<16x32xf32> to vector<16x8xf32>
    %295 = vector.extract_strided_slice %5 {offsets = [6, 16], sizes = [1, 16], strides = [1, 1]} : vector<8x32xf32> to vector<1x16xf32>
    %296 = vector.extract_strided_slice %4 {offsets = [16, 7], sizes = [16, 1], strides = [1, 1]} : vector<32x8xf32> to vector<16x1xf32>
    %297 = vector.broadcast %296 : vector<16x1xf32> to vector<16x16xf32>
    %298 = vector.broadcast %295 : vector<1x16xf32> to vector<16x16xf32>
    %299 = arith.addf %297, %298 : vector<16x16xf32>
    %cst_90 = arith.constant 0.000000e+00 : f32
    %300 = vector.broadcast %cst_90 : f32 to vector<16x16xf32>
    %301 = arith.cmpf ogt, %299, %300 : vector<16x16xf32>
    %cst_91 = arith.constant 2.000000e-01 : f32
    %302 = vector.broadcast %cst_91 : f32 to vector<16x16xf32>
    %303 = arith.mulf %302, %299 : vector<16x16xf32>
    %304 = arith.select %301, %299, %303 : vector<16x16xi1>, vector<16x16xf32>
    %cst_92 = arith.constant -9.99999995E+11 : f32
    %305 = vector.broadcast %cst_92 : f32 to vector<16x16xf32>
    %306 = arith.select %9, %304, %305 : vector<16x16xi1>, vector<16x16xf32>
    %cst_93 = arith.constant dense<0xFF800000> : vector<16xf32>
    %307 = vector.multi_reduction <maximumf>, %306, %cst_93 [1] : vector<16x16xf32> to vector<16xf32>
    %308 = vector.shape_cast %307 : vector<16xf32> to vector<16x1xf32>
    %309 = vector.broadcast %308 : vector<16x1xf32> to vector<16x16xf32>
    %310 = arith.subf %306, %309 : vector<16x16xf32>
    %311 = math.exp %310 : vector<16x16xf32>
    %cst_94 = arith.constant dense<0.000000e+00> : vector<16xf32>
    %312 = vector.multi_reduction <add>, %311, %cst_94 [1] : vector<16x16xf32> to vector<16xf32>
    %313 = vector.shape_cast %312 : vector<16xf32> to vector<16x1xf32>
    %314 = tpu.reciprocal %313 {approx = true} : vector<16x1xf32> -> vector<16x1xf32>
    %315 = arith.mulf %313, %314 : vector<16x1xf32>
    %cst_95 = arith.constant 2.000000e+00 : f32
    %316 = vector.broadcast %cst_95 : f32 to vector<16x1xf32>
    %317 = arith.subf %316, %315 : vector<16x1xf32>
    %318 = arith.mulf %314, %317 : vector<16x1xf32>
    %319 = vector.broadcast %318 : vector<16x1xf32> to vector<16x16xf32>
    %320 = arith.mulf %311, %319 : vector<16x16xf32>
    %cst_96 = arith.constant dense<0.000000e+00> : vector<16x8xf32>
    %321 = tpu.matmul %320, %294, %cst_96 {dimension_numbers = #tpu.dot_dimension_numbers<[1], [0], [0], [1], [0, 0, 1, 1], [], []>} : vector<16x16xf32>, vector<16x8xf32>, vector<16x8xf32> -> vector<16x8xf32>
    %cst_97 = arith.constant 0.000000e+00 : f32
    %322 = vector.broadcast %cst_97 : f32 to vector<16x8xf32>
    %323 = arith.cmpf ogt, %321, %322 : vector<16x8xf32>
    %cst_98 = arith.constant 0.000000e+00 : f32
    %324 = vector.broadcast %cst_98 : f32 to vector<16x8xf32>
    %325 = arith.minimumf %321, %324 : vector<16x8xf32>
    %326 = math.exp %325 : vector<16x8xf32>
    %cst_99 = arith.constant 1.000000e+00 : f32
    %327 = vector.broadcast %cst_99 : f32 to vector<16x8xf32>
    %328 = arith.subf %326, %327 : vector<16x8xf32>
    %329 = arith.select %323, %321, %328 : vector<16x8xi1>, vector<16x8xf32>
    %330 = arith.addf %329, %294 : vector<16x8xf32>
    %331 = vector.extract_strided_slice %173 {offsets = [0, 24], sizes = [16, 8], strides = [1, 1]} : vector<16x32xf32> to vector<16x8xf32>
    %332 = arith.addf %330, %331 : vector<16x8xf32>
    %c16_100 = arith.constant 16 : index
    %c24_101 = arith.constant 24 : index
    %333 = vector.load %arg5[%c16_100, %c24_101] : memref<32x32xf32, #tpu.memory_space<vmem>>, vector<16x8xf32>
    tpu.vector_store %arg5[%c16_100, %c24_101], %332 {strides = array<i32>} : memref<32x32xf32, #tpu.memory_space<vmem>>, vector<16x8xf32>,
    return
  }
  func.func @transform_0(%arg0: i32) -> (i32, i32) {
    %c0_i32 = arith.constant 0 : i32
    %c0_i32_0 = arith.constant 0 : i32
    return %arg0, %c0_i32 : i32, i32
  }
  func.func @transform_1(%arg0: i32) -> (i32, i32) {
    %c0_i32 = arith.constant 0 : i32
    %c0_i32_0 = arith.constant 0 : i32
    %c0_i32_1 = arith.constant 0 : i32
    return %c0_i32, %c0_i32_0 : i32, i32
  }
  func.func @transform_2(%arg0: i32) -> (i32, i32) {
    %c0_i32 = arith.constant 0 : i32
    %c0_i32_0 = arith.constant 0 : i32
    %c0_i32_1 = arith.constant 0 : i32
    return %c0_i32, %c0_i32_0 : i32, i32
  }
  func.func @transform_3(%arg0: i32) -> (i32, i32) {
    %c0_i32 = arith.constant 0 : i32
    %c0_i32_0 = arith.constant 0 : i32
    %c0_i32_1 = arith.constant 0 : i32
    return %c0_i32, %c0_i32_0 : i32, i32
  }
  func.func @transform_4(%arg0: i32) -> (i32, i32) {
    %c0_i32 = arith.constant 0 : i32
    %c0_i32_0 = arith.constant 0 : i32
    return %arg0, %c0_i32 : i32, i32
  }
}

</mosaic_0001>

<bundles_post_ra>
// kernel: tpu_custom_call.1
= control target key start
LH: loop header
LB: loop body
LE: loop exit
PB: predicated region body
PF: predicated region fallthrough
CT: control target
= control target key end

     0   :  { %s2255_s15 = smov 0   ;;  %s2790_s0 = inlined_call_operand.vmem [shape: f32[64,32], index: 0, kind: input, shape index: {}]   ;;  %s2791_s1 = inlined_call_operand.vmem [shape: s8[16,16], index: 1, kind: input, shape index: {}]   ;;  %s2792_s2 = inlined_call_operand.vmem [shape: f32[32,32], index: 2, kind: input, shape index: {}]   ;;  %s2793_s3 = inlined_call_operand.vmem [shape: f32[32,8], index: 3, kind: input, shape index: {}]   ;;  %s2794_s4 = inlined_call_operand.vmem [shape: f32[64,32], index: 4, kind: output, shape index: {}]  }
   0x1 LB: > { %s1841_s16 = sadd.s32 4294967295, %s2218_s15   ;;  %p1845_p0 = scmp.ge.s32.totalorder %s2218_s15, 1  ;;  %s2218_s15 = sphi %s2255_s15, %s14_s15  }
   0x2   : > { %p163_p1 = scmp.lt.s32.totalorder %s2218_s15, 3 }
   0x4   : > { %p164_p2 = pnand %p1845_p0, %p163_p1 }
   0x5   : > { %v205_v0 = vld [vmem:[%s2792_s2] sm:$0xff] (!%p164_p2)  ;;  %v206_v1 = vld [vmem:[%s2792_s2 + $0x8] sm:$0xff] (!%p164_p2)  ;;  %v207_v2 = vld [vmem:[%s2792_s2 + $0x10] sm:$0xff] (!%p164_p2)  ;;  %s1846_s23 = sshll.u32 (!%p164_p2), %s1841_s16, 2  ;;  %vm209_vm0 = vcmask (!%p164_p2), 261120   ;;  %v2220_v16 = vmov (!%p164_p2), 1   ;;  %v458_v37 = vlaneseq (!%p164_p2) }
   0x6   : > { %167 = sbr.rel (%p164_p2) target bundleno = 1497 (0x5d9), region = 36  ;;  %v2028_v3 = vpack.c.bf16 (!%p164_p2), %v206_v1, %v205_v0  ;;  %v208_v4 = vld [vmem:[%s2792_s2 + $0x18] sm:$0xff] (!%p164_p2)  ;;  %p190_p3 = scmp.lt.s32.totalorder (!%p164_p2), %s1846_s23, 7  ;;  %v307_v5 = vld [vmem:[%s2793_s3] sm:$0xff] (!%p164_p2)  ;;  %v308_v6 = vld [vmem:[%s2793_s3 + $0x8] sm:$0xff] (!%p164_p2)  ;;  %2095 = vset.pattern.permute.xlu0 (!%p164_p2), %v2220_v16  ;;  %v2221_v23 = vmov (!%p164_p2), 3  }
   0x7   : > { %v2032_v7 = vpack.c.bf16 (!%p164_p2), %v208_v4, %v207_v2  ;;  %v2036_v8 = vpack.c.bf16 (!%p164_p2), %v308_v6, %v307_v5  ;;  %v309_v9 = vld [vmem:[%s2793_s3 + $0x10] sm:$0xff] (!%p164_p2)  ;;  %v310_v10 = vld [vmem:[%s2793_s3 + $0x18] sm:$0xff] (!%p164_p2)  ;;  %2104 = vset.pattern.permute.xlu1 (!%p164_p2), %v2221_v23  ;;  %v2222_v28 = vmov (!%p164_p2), 5   ;;  %v2223_v29 = vmov (!%p164_p2), 7   ;;  %v1893_v40 = vld [vmem:[%s2791_s1] sm:$0xf] (!%p164_p2)  }
   0x8   : > { %2029 = vmatprep.subr.bf16.mxu0 (!%p164_p2), %v2028_v3  ;;  %v2040_v11 = vpack.c.bf16 (!%p164_p2), %v310_v10, %v309_v9  ;;  %v2350_v41 = vshrl.u32 (!%p164_p2), %v458_v37, 7  ;;  %v1894_v42 = vunpack.c.0.s8 (!%p164_p2), %v1893_v40  ;;  %v1895_v44 = vunpack.c.1.s8 (!%p164_p2), %v1893_v40  ;;  %s2224_s14 = smov (!%p164_p2), 112   ;;  %s2225_s16 = smov (!%p164_p2), 120  }
   0x9   : > { %2031 = vmatpush3.bf16.msra.mxu0 (!%p164_p2), %v2028_v3  ;;  %2037 = vmatprep.subr.bf16.mxu1 (!%p164_p2), %v2036_v8  ;;  %vm472_vm2 = vcmask (!%p164_p2), 130048   ;;  %s2226_s17 = smov (!%p164_p2), 104   ;;  %s2227_s21 = smov (!%p164_p2), 8  }
   0xa   : > { %2033 = vmatprep.subr.bf16.mxu0 (!%p164_p2), %v2032_v7  ;;  %2039 = vmatpush3.bf16.msra.mxu1 (!%p164_p2), %v2036_v8  ;;  %v460_v46 = vsub.s32 (!%p164_p2), 0, %v2350_v41  ;;  %v611_v47 = vsub.s32 (!%p164_p2), 2, %v2350_v41  ;;  %v781_v48 = vsub.s32 (!%p164_p2), 4, %v2350_v41  ;;  %v2357_v49 = vcvt.s32.f32 (!%p164_p2), %v1894_v42  ;;  %s2228_s22 = smov (!%p164_p2), 16  }
   0xb   : > { %2041 = vmatprep.subr.bf16.mxu1 (!%p164_p2), %v2040_v11  ;;  %v2361_v51 = vcvt.s32.f32 (!%p164_p2), %v1895_v44  ;;  %v951_v44 = vsub.s32 (!%p164_p2), 6, %v2350_v41 }
   0xc   : > { %vm446_vm1 = vcmp.gt.f32.partialorder (!%p164_p2), %v2357_v49, 0.0 }
   0xd   : > { %s2796_s23 = smov (!%p190_p3, %s1846_s23), 7  ;;  %2035 = vmatpush3.bf16.msra.mxu0 %v2032_v7  ;;  %vm447_vm3 = vcmp.gt.f32.partialorder %v2361_v51, 0.0 }
   0xe   : > { %s1847_s8 = sshll.u32 %s2796_s23, 3  ;;  %2043 = vmatpush3.bf16.msra.mxu1 %v2040_v11  ;;  %s2229_s23 = smov 24  }
   0xf   : > { %s2295_s11 = scalar_lea.vmem %s2790_s0, %s1847_s8  ;;  %s2713_s20 = scalar_lea.vmem %s2794_s4, %s1847_s8 }
  0x10   : > { %v2298_v12 = vld [vmem:[%s2295_s11] sm:$0xff]  ;;  %v2303_v13 = vld [vmem:[%s2295_s11 + $0x8] sm:$0xff]  ;;  %v2306_v14 = vld [vmem:[%s2295_s11 + $0x10] sm:$0xff] }
  0x11   : > { %1952 = vmatprep.mubr.msk.f32.mxu0 %vm209_vm0, %v2298_v12  ;;  %v2313_v15 = vld [vmem:[%s2295_s11 + $0x18] sm:$0xff] }
  0x12   : > { %1953 = vmatmul.mubr.msk.f32.vlgmr.msra.gmra.mrb[0].mxu0 %vm209_vm0, %v2303_v13 }
  0x13   : > { %1955 = vmatprep.mubr.msk.f32.mxu0 %vm209_vm0, %v2306_v14 }
  0x16   : > { %1956 = vmatmul.mubr.msk.f32.gmra.mrb[2].mxu0 %vm209_vm0, %v2313_v15 }
  0xe5   : > { %v2317_v17 = vpop.f32.mrb[0].mxu0 }
  0xe6   : > { %v2319_v18 = vpop.f32.mrb[1].mxu0 }
  0xe7   : > { %1966 = vmatprep.mubr.msk.f32.mxu1 %vm209_vm0, %v2319_v18  ;;  %v2044_v19 = vpack.c.bf16 %v2317_v17, %v2319_v18 }
  0xe8   : > { %1967 = vmatmul.mubr.msk.f32.vlgmr.msra.gmra.mrb[0].mxu1 %vm209_vm0, %v2317_v17 }
  0xe9   : > { %v2327_v20 = vpop.f32.mrb[2].mxu0  ;;  %2045 = vmatprep.subr.bf16.mxu0 %v2044_v19 }
  0xea   : > { %v2329_v21 = vpop.f32.mrb[3].mxu0  ;;  %2047 = vmatpush3.bf16.msra.mxu0 %v2044_v19 }
  0xeb   : > { %1969 = vmatprep.mubr.msk.f32.mxu1 %vm209_vm0, %v2329_v21  ;;  %v2335_v22 = vpack.c.bf16 %v2327_v20, %v2329_v21 }
  0xec   : > { %1970 = vmatmul.mubr.msk.f32.gmra.mrb[2].mxu1 %vm209_vm0, %v2327_v20 }
 0x1bb   : > { %v1968_v24 = vpop.f32.mrb[0].mxu1 }
 0x1bc   : > { %455 = vperm.xlu0 %2095, %v1968_v24   ;;  %v389_v25 = vpop.f32.mrb[1].mxu1 }
 0x1bf   : > { %v1971_v26 = vpop.f32.mrb[2].mxu1 }
 0x1c0   : > { %2096 = vset.pattern.permute.xlu0 %v2221_v23  ;;  %1271 = vperm.xlu1 %2104, %v1971_v26   ;;  %v399_v27 = vpop.f32.mrb[3].mxu1 }
 0x1c1   : > { %606 = vperm.xlu0 %2096, %v1968_v24  }
 0x1c4   : > { %2105 = vset.pattern.permute.xlu1 %v2222_v28 }
 0x1c5   : > { %2097 = vset.pattern.permute.xlu0 %v2222_v28  ;;  %1444 = vperm.xlu1 %2105, %v1971_v26  }
 0x1c6   : > { %776 = vperm.xlu0 %2097, %v1968_v24  }
 0x1c9   : > { %2108 = vset.pattern.permute.xlu1 %v2221_v23 }
 0x1ca   : > { %2098 = vset.pattern.permute.xlu0 %v2223_v29  ;;  %1267 = vperm.xlu1 %2108, %v399_v27  }
 0x1cb   : > { %946 = vperm.xlu0 %2098, %v1968_v24  }
 0x1ce   : > { %2110 = vset.pattern.permute.xlu1 %v2223_v29 }
 0x1cf   : > { %2099 = vset.pattern.permute.xlu0 %v2220_v16  ;;  %1613 = vperm.xlu1 %2110, %v399_v27  }
 0x1d0   : > { %450 = vperm.xlu0 %2099, %v389_v25  }
 0x1d4   : > { %2100 = vset.pattern.permute.xlu0 %v2221_v23 }
 0x1d5   : > { %602 = vperm.xlu0 %2100, %v389_v25  }
 0x1d9   : > { %2101 = vset.pattern.permute.xlu0 %v2222_v28 }
 0x1da   : > { %772 = vperm.xlu0 %2101, %v389_v25  }
 0x1de   : > { %2102 = vset.pattern.permute.xlu0 %v2223_v29 }
 0x1df   : > { %942 = vperm.xlu0 %2102, %v389_v25  }
 0x1e3   : > { %2103 = vset.pattern.permute.xlu0 %v2220_v16 }
 0x1e4   : > { %1118 = vperm.xlu0 %2103, %v1971_v26  }
 0x1e8   : > { %2106 = vset.pattern.permute.xlu0 %v2223_v29 }
 0x1e9   : > { %1617 = vperm.xlu0 %2106, %v1971_v26  }
 0x1ed   : > { %2107 = vset.pattern.permute.xlu0 %v2220_v16 }
 0x1ee   : > { %1113 = vperm.xlu0 %2107, %v399_v27  }
 0x1f2   : > { %2109 = vset.pattern.permute.xlu0 %v2222_v28 }
 0x1f3   : > { %1440 = vperm.xlu0 %2109, %v399_v27  }
 0x1f7   : > { %2111 = vset.pattern.permute.xlu0 %v2223_v29 }
 0x1f8   : > { %408 = vxpose.xlu1.b32.start [1/4] (short) (narrow) %v389_v25, 8 }
 0x1fc   : > { %409 = vxpose.xlu1.b32.cont [2/4] (short) (narrow) %v1968_v24, 8 }
 0x200   : > { %410 = vxpose.xlu1.b32.cont [3/4] (short) (narrow) %v399_v27, 8 }
 0x204   : > { %411 = vxpose.xlu1.b32.end [4/4] (short) (narrow) %v1971_v26, 8 }
 0x23b   : > { %v456_v30 = vpop.permute.xlu0 %455 }
 0x23f   : > { %v2339_v33 = vpop.permute.xlu1 %1271 }
 0x240   : > { %v607_v31 = vpop.permute.xlu0 %606 }
 0x244   : > { %v2343_v35 = vpop.permute.xlu1 %1444 }
 0x245   : > { %v777_v32 = vpop.permute.xlu0 %776 }
 0x249   : > { %v2345_v38 = vpop.permute.xlu1 %1267 }
 0x24a   : > { %v2341_v34 = vpop.permute.xlu0 %946 }
 0x24e   : > { %v2352_v43 = vpop.permute.xlu1 %1613 }
 0x24f   : > { %v451_v36 = vpop.permute.xlu0 %450 }
 0x254   : > { %v603_v39 = vpop.permute.xlu0 %602 }
 0x259   : > { %v773_v45 = vpop.permute.xlu0 %772 }
 0x25e   : > { %v2371_v55 = vpop.permute.xlu0 %942 }
 0x263   : > { %v1119_v9 = vpop.permute.xlu0 %1118 }
 0x268   : > { %v1618_v28 = vpop.permute.xlu0 %1617 }
 0x278   : > { %v2359_v50 = vpop.trf.xlu1 }
 0x279   : > { %v461_v52 = vrot.slane %v2359_v50, %v460_v46  ;;  %v2365_v53 = vrot.slane %v2359_v50, %v611_v47  ;;  %v2368_v54 = vrot.slane %v2359_v50, %v781_v48  ;;  %v952_v47 = vrot.slane %v2359_v50, %v951_v44 }
 0x27b   : > { %v462_v56 = vadd.f32 %v461_v52, %v451_v36  ;;  %v463_v57 = vadd.f32 %v461_v52, %v456_v30  ;;  %v783_v58 = vadd.f32 %v2368_v54, %v773_v45  ;;  %v614_v59 = vadd.f32 %v2365_v53, %v607_v31 }
 0x27c   : > { %v784_v60 = vadd.f32 %v2368_v54, %v777_v32  ;;  %v613_v61 = vadd.f32 %v2365_v53, %v603_v39  ;;  %v1114_v32 = vpop.permute.xlu0 %1113  ;;  %v1122_v42 = vadd.f32 %v1119_v9, %v461_v52  ;;  %v1275_v46 = vadd.f32 %v2339_v33, %v2365_v53 }
 0x27d   : > { %vm464_vm4 = vcmp.gt.f32.partialorder %v462_v56, 0.0  ;;  %v466_v62 = vmul.f32 0.2, %v462_v56  ;;  %vm465_vm5 = vcmp.gt.f32.partialorder %v463_v57, 0.0  ;;  %v467_v63 = vmul.f32 0.2, %v463_v57 }
 0x27e   : > { %vm785_vm6 = vcmp.gt.f32.partialorder %v783_v58, 0.0  ;;  %v787_v0 = vmul.f32 0.2, %v783_v58  ;;  %vm616_vm7 = vcmp.gt.f32.partialorder %v614_v59, 0.0  ;;  %v618_v1 = vmul.f32 0.2, %v614_v59 }
 0x27f   : > { %v468_v2 = vsel %vm464_vm4, %v462_v56, %v466_v62  ;;  %v469_v3 = vsel %vm465_vm5, %v463_v57, %v467_v63  ;;  %vm786_vm8 = vcmp.gt.f32.partialorder %v784_v60, 0.0  ;;  %v788_v4 = vmul.f32 0.2, %v784_v60 }
 0x280   : > { %v2380_v5 = vsel %vm446_vm1, %v468_v2, -1e+12  ;;  %v2384_v6 = vsel %vm447_vm3, %v469_v3, -1e+12  ;;  %v789_v7 = vsel %vm785_vm6, %v783_v58, %v787_v0  ;;  %v620_v8 = vsel %vm616_vm7, %v614_v59, %v618_v1 }
 0x281   : > { %v473_v10 = vsel %vm472_vm2, %v2380_v5, -inf  ;;  %v476_v11 = vsel %vm472_vm2, %v2384_v6, -inf  ;;  %v2392_v16 = vsel %vm446_vm1, %v789_v7, -1e+12  ;;  %v2396_v19 = vsel %vm447_vm3, %v620_v8, -1e+12 }
 0x282   : > { %474 = vmax.xlane.f32.xlu1 %v473_v10  ;;  %477 = vmax.xlane.f32.xlu0 %v476_v11  ;;  %v790_v23 = vsel %vm786_vm8, %v784_v60, %v788_v4  ;;  %v617_v24 = vmul.f32 0.2, %v613_v61  ;;  %vm615_vm9 = vcmp.gt.f32.partialorder %v613_v61, 0.0  ;;  %v793_v25 = vsel %vm472_vm2, %v2392_v16, -inf }
 0x283   : > { %v626_v26 = vsel %vm472_vm2, %v2396_v19, -inf  ;;  %v2404_v27 = vsel %vm447_vm3, %v790_v23, -1e+12  ;;  %v1121_v37 = vadd.f32 %v1114_v32, %v461_v52  ;;  %v1126_v45 = vmul.f32 0.2, %v1122_v42 }
 0x284   : > { %v619_v29 = vsel %vm615_vm9, %v613_v61, %v617_v24  ;;  %v796_v30 = vsel %vm472_vm2, %v2404_v27, -inf  ;;  %vm1124_vm11 = vcmp.gt.f32.partialorder %v1122_v42, 0.0  ;;  %v1279_v56 = vmul.f32 0.2, %v1275_v46 }
 0x285   : > { %v2410_v31 = vsel %vm446_vm1, %v619_v29, -1e+12  ;;  %v1125_v39 = vmul.f32 0.2, %v1121_v37  ;;  %vm1123_vm10 = vcmp.gt.f32.partialorder %v1121_v37, 0.0  ;;  %v1128_v48 = vsel %vm1124_vm11, %v1122_v42, %v1126_v45 }
 0x286   : > { %794 = vmax.xlane.f32.xlu1 %v793_v25  ;;  %627 = vmax.xlane.f32.xlu0 %v626_v26  ;;  %v623_v36 = vsel %vm472_vm2, %v2410_v31, -inf  ;;  %v1448_v57 = vadd.f32 %v2343_v35, %v2368_v54  ;;  %vm1277_vm12 = vcmp.gt.f32.partialorder %v1275_v46, 0.0  ;;  %v1621_v52 = vadd.f32 %v1618_v28, %v952_v47  ;;  %v1441_v35 = vpop.permute.xlu0 %1440 }
 0x287   : > { %v1127_v40 = vsel %vm1123_vm10, %v1121_v37, %v1125_v39  ;;  %v1281_v58 = vsel %vm1277_vm12, %v1275_v46, %v1279_v56  ;;  %v1274_v33 = vadd.f32 %v2345_v38, %v2365_v53  ;;  %v953_v50 = vadd.f32 %v952_v47, %v2371_v55 }
 0x288   : > { %v1452_v59 = vmul.f32 0.2, %v1448_v57  ;;  %vm1450_vm13 = vcmp.gt.f32.partialorder %v1448_v57, 0.0  ;;  %v1625_v60 = vmul.f32 0.2, %v1621_v52  ;;  %vm1623_vm14 = vcmp.gt.f32.partialorder %v1621_v52, 0.0 }
 0x289   : > { %v1278_v62 = vmul.f32 0.2, %v1274_v33  ;;  %v1447_v63 = vadd.f32 %v1441_v35, %v2368_v54  ;;  %vm1276_vm15 = vcmp.gt.f32.partialorder %v1274_v33, 0.0  ;;  %v957_v0 = vmul.f32 0.2, %v953_v50 }
 0x28a   : > { %797 = vmax.xlane.f32.xlu0 %v796_v30  ;;  %v1454_v41 = vsel %vm1450_vm13, %v1448_v57, %v1452_v59  ;;  %v1627_v61 = vsel %vm1623_vm14, %v1621_v52, %v1625_v60  ;;  %vm955_vm0 = vcmp.gt.f32.partialorder %v953_v50, 0.0  ;;  %v1620_v3 = vadd.f32 %v2352_v43, %v952_v47 }
 0x28b   : > { %v1280_v1 = vsel %vm1276_vm15, %v1274_v33, %v1278_v62  ;;  %v1451_v2 = vmul.f32 0.2, %v1447_v63  ;;  %vm1449_vm4 = vcmp.gt.f32.partialorder %v1447_v63, 0.0  ;;  %v959_v38 = vsel %vm955_vm0, %v953_v50, %v957_v0 }
 0x28c   : > { %v2433_v55 = vsel %vm446_vm1, %v959_v38, -1e+12  ;;  %v1624_v4 = vmul.f32 0.2, %v1620_v3  ;;  %vm1622_vm5 = vcmp.gt.f32.partialorder %v1620_v3, 0.0  ;;  %v954_v43 = vadd.f32 %v952_v47, %v2341_v34 }
 0x28d   : > { %v1453_v53 = vsel %vm1449_vm4, %v1447_v63, %v1451_v2  ;;  %v963_v54 = vsel %vm472_vm2, %v2433_v55, -inf }
 0x28e   : > { %624 = vmax.xlane.f32.xlu0 %v623_v36  ;;  %v1626_v7 = vsel %vm1622_vm5, %v1620_v3, %v1624_v4  ;;  %v958_v8 = vmul.f32 0.2, %v954_v43  ;;  %vm956_vm6 = vcmp.gt.f32.partialorder %v954_v43, 0.0 }
 0x290   : > { %v960_v9 = vsel %vm956_vm6, %v954_v43, %v958_v8 }
 0x291   : > { %v2448_v10 = vsel %vm447_vm3, %v960_v9, -1e+12 }
 0x292   : > { %v966_v34 = vsel %vm472_vm2, %v2448_v10, -inf }
 0x297   : > { %1131 = vrot.lane.b32.xlu1 %v1127_v40, %s2224_s14 }
 0x2a4   : > { %1133 = vrot.lane.b32.xlu0 %v1128_v48, %s2224_s14 }
 0x2a8   : > { %1286 = vrot.lane.b32.xlu0 %v1281_v58, %s2224_s14 }
 0x2ac   : > { %1459 = vrot.lane.b32.xlu0 %v1454_v41, %s2224_s14 }
 0x2b0   : > { %1632 = vrot.lane.b32.xlu0 %v1627_v61, %s2224_s14 }
 0x2b4   : > { %1284 = vrot.lane.b32.xlu0 %v1280_v1, %s2224_s14 }
 0x2b8   : > { %1457 = vrot.lane.b32.xlu0 %v1453_v53, %s2224_s14 }
 0x2bb   : > { %964 = vmax.xlane.f32.xlu1 %v963_v54 }
 0x2bc   : > { %1630 = vrot.lane.b32.xlu0 %v1626_v7, %s2224_s14 }
 0x2cc   : > { %651 = vrot.lane.b32.xlu1 %v2319_v18, %s2225_s16 }
 0x2d0   : > { %821 = vrot.lane.b32.xlu1 %v2319_v18, %s2224_s14 }
 0x2d4   : > { %823 = vrot.lane.b32.xlu1 %v2317_v17, %s2224_s14 }
 0x2d8   : > { %991 = vrot.lane.b32.xlu1 %v2319_v18, %s2226_s17 }
 0x2db   : > { %967 = vmax.xlane.f32.xlu0 %v966_v34 }
 0x2dc   : > { %1320 = vrot.lane.b32.xlu1 %v2329_v21, %s2225_s16 }
 0x2f1   : > { %653 = vrot.lane.b32.xlu0 %v2317_v17, %s2225_s16 }
 0x2f5   : > { %993 = vrot.lane.b32.xlu0 %v2317_v17, %s2226_s17 }
 0x30f   : > { %v475_v11 = vpop.xlane.xlu1 %474  ;;  %v478_v23 = vpop.xlane.xlu0 %477 }
 0x310   : > { %v480_v49 = vsub.f32 %v2384_v6, %v478_v23  ;;  %v479_v38 = vsub.f32 %v2380_v5, %v475_v11 }
 0x312   : > { %v483_v1 = vmul.f32 1.442695, %v480_v49  ;;  %v481_v54 = vmul.f32 1.442695, %v479_v38 }
 0x313   : > { %v795_v24 = vpop.xlane.xlu1 %794  ;;  %v628_v25 = vpop.xlane.xlu0 %627 }
 0x314   : > { %v630_v2 = vsub.f32 %v2396_v19, %v628_v25  ;;  %2112 = vpow2.f32 %v483_v1  ;;  %v799_v19 = vsub.f32 %v2392_v16, %v795_v24 }
 0x316   : > { %v633_v53 = vmul.f32 1.442695, %v630_v2  ;;  %v801_v34 = vmul.f32 1.442695, %v799_v19 }
 0x317   : > { %v1132_v26 = vpop.permute.xlu1 %1131  ;;  %v798_v28 = vpop.xlane.xlu0 %797 }
 0x318   : > { %v2462_v29 = vsel %vm446_vm1, %v1132_v26, -1e+12  ;;  %v800_v4 = vsub.f32 %v2404_v27, %v798_v28  ;;  %2114 = vpow2.f32 %v633_v53 }
 0x319   : > { %v1139_v30 = vsel %vm472_vm2, %v2462_v29, -inf  ;;  %2116 = vpow2.f32 %v481_v54 }
 0x31a   : > { %1140 = vmax.xlane.f32.xlu1 %v1139_v30  ;;  %v803_v6 = vmul.f32 1.442695, %v800_v4 }
 0x31b   : > { %v625_v32 = vpop.xlane.xlu0 %624 }
 0x31c   : > { %v629_v7 = vsub.f32 %v2410_v31, %v625_v32  ;;  %2118 = vpow2.f32 %v803_v6 }
 0x31e   : > { %v631_v43 = vmul.f32 1.442695, %v629_v7  ;;  %v2531_v8 = vpop.eup %2112 }
 0x31f   : > { %v1134_v36 = vpop.permute.xlu0 %1133  ;;  %v488_v5 = vsel %vm472_vm2, %v2531_v8, 0.0 }
 0x320   : > { %v2468_v37 = vsel %vm447_vm3, %v1134_v36, -1e+12  ;;  %2120 = vpow2.f32 %v631_v43 }
 0x321   : > { %v1142_v39 = vsel %vm472_vm2, %v2468_v37, -inf  ;;  %2122 = vpow2.f32 %v801_v34 }
 0x322   : > { %1143 = vmax.xlane.f32.xlu0 %v1142_v39  ;;  %v2536_v27 = vpop.eup %2114 }
 0x323   : > { %v1287_v40 = vpop.permute.xlu0 %1286  ;;  %v2539_v16 = vpop.eup %2116  ;;  %v638_v24 = vsel %vm472_vm2, %v2536_v27, 0.0 }
 0x324   : > { %v2474_v42 = vsel %vm447_vm3, %v1287_v40, -1e+12 }
 0x325   : > { %v1295_v44 = vsel %vm472_vm2, %v2474_v42, -inf }
 0x326   : > { %1296 = vmax.xlane.f32.xlu0 %v1295_v44  ;;  %v2543_v25 = vpop.eup %2118 }
 0x327   : > { %v1460_v45 = vpop.permute.xlu0 %1459  ;;  %v808_v30 = vsel %vm472_vm2, %v2543_v25, 0.0 }
 0x328   : > { %v2480_v46 = vsel %vm447_vm3, %v1460_v45, -1e+12 }
 0x329   : > { %v1468_v47 = vsel %vm472_vm2, %v2480_v46, -inf }
 0x32a   : > { %1469 = vmax.xlane.f32.xlu0 %v1468_v47  ;;  %v2553_v32 = vpop.eup %2120 }
 0x32b   : > { %v1633_v48 = vpop.permute.xlu0 %1632  ;;  %v635_v44 = vsel %vm472_vm2, %v2553_v32, 0.0  ;;  %v2565_v45 = vpop.eup %2122 }
 0x32c   : > { %v2486_v56 = vsel %vm447_vm3, %v1633_v48, -1e+12  ;;  %v805_v48 = vsel %vm472_vm2, %v2565_v45, 0.0  ;;  %vm598_vm3 = vcmask 64512  }
 0x32d   : > { %v1641_v57 = vsel %vm472_vm2, %v2486_v56, -inf }
 0x32e   : > { %1642 = vmax.xlane.f32.xlu0 %v1641_v57 }
 0x32f   : > { %v1285_v58 = vpop.permute.xlu0 %1284 }
 0x330   : > { %v2492_v59 = vsel %vm446_vm1, %v1285_v58, -1e+12 }
 0x331   : > { %v1292_v52 = vsel %vm472_vm2, %v2492_v59, -inf }
 0x332   : > { %1293 = vmax.xlane.f32.xlu1 %v1292_v52 }
 0x333   : > { %v1458_v41 = vpop.permute.xlu0 %1457 }
 0x334   : > { %v2498_v60 = vsel %vm446_vm1, %v1458_v41, -1e+12 }
 0x335   : > { %v1465_v51 = vsel %vm472_vm2, %v2498_v60, -inf }
 0x336   : > { %1466 = vmax.xlane.f32.xlu1 %v1465_v51 }
 0x337   : > { %v1631_v33 = vpop.permute.xlu0 %1630 }
 0x338   : > { %v2504_v50 = vsel %vm446_vm1, %v1631_v33, -1e+12 }
 0x339   : > { %v1638_v35 = vsel %vm472_vm2, %v2504_v50, -inf }
 0x33a   : > { %1639 = vmax.xlane.f32.xlu1 %v1638_v35 }
 0x344   : > { %1322 = vrot.lane.b32.xlu0 %v2327_v20, %s2225_s16 }
 0x348   : > { %v965_v61 = vpop.xlane.xlu1 %964  ;;  %1495 = vrot.lane.b32.xlu0 %v2327_v20, %s2224_s14 }
 0x349   : > { %v969_v9 = vsub.f32 %v2433_v55, %v965_v61 }
 0x34b   : > { %1493 = vrot.lane.b32.xlu1 %v2329_v21, %s2224_s14  ;;  %v971_v11 = vmul.f32 1.442695, %v969_v9 }
 0x34c   : > { %v2514_v62 = vpop.permute.xlu1 %651 }
 0x34d   : > { %2124 = vpow2.f32 %v971_v11 }
 0x350   : > { %v2516_v63 = vpop.permute.xlu1 %821 }
 0x354   : > { %v2519_v0 = vpop.permute.xlu1 %823 }
 0x355   : > { %v2524_v3 = vpack.c.bf16 %v2519_v0, %v2516_v63 }
 0x357   : > { %2053 = vmatprep.subr.bf16.mxu0 %v2524_v3  ;;  %v2568_v47 = vpop.eup %2124 }
 0x358   : > { %v2555_v36 = vpop.permute.xlu1 %991  ;;  %v975_v52 = vsel %vm472_vm2, %v2568_v47, 0.0 }
 0x35c   : > { %v2578_v41 = vpop.permute.xlu1 %1320 }
 0x367   : > { %489 = vadd.xlane.f32.xlu0 %v488_v5 }
 0x368   : > { %v968_v23 = vpop.xlane.xlu0 %967 }
 0x369   : > { %v970_v31 = vsub.f32 %v2448_v10, %v968_v23  ;;  %v485_v10 = vsel %vm472_vm2, %v2539_v16, 0.0 }
 0x36b   : > { %v973_v55 = vmul.f32 1.442695, %v970_v31  ;;  %639 = vadd.xlane.f32.xlu0 %v638_v24 }
 0x36c   : > { %v2545_v26 = vpop.permute.xlu0 %653 }
 0x36d   : > { %2126 = vpow2.f32 %v973_v55  ;;  %v2048_v28 = vpack.c.bf16 %v2545_v26, %v2514_v62 }
 0x36f   : > { %809 = vadd.xlane.f32.xlu0 %v808_v30  ;;  %486 = vadd.xlane.f32.xlu1 %v485_v10 }
 0x370   : > { %2049 = vmatprep.subr.bf16.mxu1 %v2048_v28  ;;  %v2557_v39 = vpop.permute.xlu0 %993 }
 0x371   : > { %2051 = vmatpush3.bf16.msra.mxu1 %v2048_v28  ;;  %v2561_v40 = vpack.c.bf16 %v2557_v39, %v2555_v36 }
 0x373   : > { %636 = vadd.xlane.f32.xlu1 %v635_v44  ;;  %2057 = vmatprep.subr.bf16.mxu1 %v2561_v40 }
 0x377   : > { %v2572_v57 = vpop.eup %2126  ;;  %806 = vadd.xlane.f32.xlu1 %v805_v48 }
 0x378   : > { %v978_v58 = vsel %vm472_vm2, %v2572_v57, 0.0 }
 0x379   : > { %979 = vadd.xlane.f32.xlu0 %v978_v58 }
 0x37b   : > { %976 = vadd.xlane.f32.xlu1 %v975_v52 }
 0x3a7   : > { %v1141_v51 = vpop.xlane.xlu1 %1140 }
 0x3a8   : > { %v1145_v33 = vsub.f32 %v2462_v29, %v1141_v51 }
 0x3aa   : > { %v1147_v35 = vmul.f32 1.442695, %v1145_v33 }
 0x3ac   : > { %2128 = vpow2.f32 %v1147_v35 }
 0x3af   : > { %v1144_v61 = vpop.xlane.xlu0 %1143 }
 0x3b0   : > { %v1146_v49 = vsub.f32 %v2468_v37, %v1144_v61 }
 0x3b2   : > { %v1149_v1 = vmul.f32 1.442695, %v1146_v49 }
 0x3b3   : > { %v1297_v2 = vpop.xlane.xlu0 %1296 }
 0x3b4   : > { %2130 = vpow2.f32 %v1149_v1  ;;  %v1299_v38 = vsub.f32 %v2474_v42, %v1297_v2 }
 0x3b6   : > { %v2583_v53 = vpop.eup %2128  ;;  %v1302_v4 = vmul.f32 1.442695, %v1299_v38 }
 0x3b7   : > { %v1470_v54 = vpop.xlane.xlu0 %1469  ;;  %v1151_v6 = vsel %vm472_vm2, %v2583_v53, 0.0 }
 0x3b8   : > { %2132 = vpow2.f32 %v1302_v4  ;;  %v1472_v29 = vsub.f32 %v2480_v46, %v1470_v54  ;;  %1152 = vadd.xlane.f32.xlu1 %v1151_v6 }
 0x3ba   : > { %v1475_v7 = vmul.f32 1.442695, %v1472_v29 }
 0x3bb   : > { %v1643_v19 = vpop.xlane.xlu0 %1642 }
 0x3bc   : > { %2134 = vpow2.f32 %v1475_v7  ;;  %v1645_v37 = vsub.f32 %v2486_v56, %v1643_v19 }
 0x3be   : > { %v2589_v43 = vpop.eup %2130  ;;  %v1648_v9 = vmul.f32 1.442695, %v1645_v37 }
 0x3bf   : > { %v1294_v42 = vpop.xlane.xlu1 %1293  ;;  %v1154_v34 = vsel %vm472_vm2, %v2589_v43, 0.0  ;;  %v2626_v35 = vpop.permute.xlu0 %1322 }
 0x3c0   : > { %2136 = vpow2.f32 %v1648_v9  ;;  %v1298_v5 = vsub.f32 %v2492_v59, %v1294_v42  ;;  %1155 = vadd.xlane.f32.xlu0 %v1154_v34 }
 0x3c2   : > { %v2594_v11 = vpop.eup %2132  ;;  %v1300_v46 = vmul.f32 1.442695, %v1298_v5 }
 0x3c3   : > { %v1467_v23 = vpop.xlane.xlu1 %1466  ;;  %v1307_v31 = vsel %vm472_vm2, %v2594_v11, 0.0  ;;  %v2634_v61 = vpop.permute.xlu0 %1495 }
 0x3c4   : > { %2138 = vpow2.f32 %v1300_v46  ;;  %v1471_v56 = vsub.f32 %v2498_v60, %v1467_v23  ;;  %1308 = vadd.xlane.f32.xlu0 %v1307_v31 }
 0x3c6   : > { %v2599_v24 = vpop.eup %2134  ;;  %v1473_v55 = vmul.f32 1.442695, %v1471_v56 }
 0x3c7   : > { %v1640_v28 = vpop.xlane.xlu1 %1639  ;;  %v1480_v30 = vsel %vm472_vm2, %v2599_v24, 0.0 }
 0x3c8   : > { %2140 = vpow2.f32 %v1473_v55  ;;  %v1644_v59 = vsub.f32 %v2504_v50, %v1640_v28  ;;  %1481 = vadd.xlane.f32.xlu0 %v1480_v30 }
 0x3ca   : > { %v2604_v10 = vpop.eup %2136  ;;  %v1646_v44 = vmul.f32 1.442695, %v1644_v59 }
 0x3cb   : > { %v1653_v48 = vsel %vm472_vm2, %v2604_v10, 0.0  ;;  %v2644_v1 = vpop.permute.xlu1 %1493 }
 0x3cc   : > { %2142 = vpow2.f32 %v1646_v44  ;;  %1654 = vadd.xlane.f32.xlu0 %v1653_v48 }
 0x3ce   : > { %v2608_v60 = vpop.eup %2138 }
 0x3cf   : > { %v1304_v58 = vsel %vm472_vm2, %v2608_v60, 0.0 }
 0x3d0   : > { %1305 = vadd.xlane.f32.xlu1 %v1304_v58 }
 0x3d2   : > { %v2612_v52 = vpop.eup %2140 }
 0x3d3   : > { %v1477_v50 = vsel %vm472_vm2, %v2612_v52, 0.0 }
 0x3d4   : > { %1478 = vadd.xlane.f32.xlu1 %v1477_v50 }
 0x3d6   : > { %v2616_v51 = vpop.eup %2142 }
 0x3d7   : > { %v1650_v33 = vsel %vm472_vm2, %v2616_v51, 0.0 }
 0x3d8   : > { %1651 = vadd.xlane.f32.xlu1 %v1650_v33 }
 0x3e2   : > { %1668 = vrot.lane.b32.xlu0 %v2327_v20, %s2226_s17 }
 0x3e6   : > { %754 = vrot.lane.b32.xlu0 %v2303_v13, %s2225_s16 }
 0x3e9   : > { %1666 = vrot.lane.b32.xlu1 %v2329_v21, %s2226_s17 }
 0x3ea   : > { %924 = vrot.lane.b32.xlu0 %v2303_v13, %s2224_s14 }
 0x3ed   : > { %752 = vrot.lane.b32.xlu1 %v2298_v12, %s2225_s16 }
 0x3ee   : > { %1094 = vrot.lane.b32.xlu0 %v2303_v13, %s2226_s17 }
 0x3f1   : > { %922 = vrot.lane.b32.xlu1 %v2298_v12, %s2224_s14 }
 0x3f2   : > { %1423 = vrot.lane.b32.xlu0 %v2313_v15, %s2225_s16 }
 0x3f4   : > { %v490_v49 = vpop.xlane.xlu0 %489 }
 0x3f5   : > { %1092 = vrot.lane.b32.xlu1 %v2298_v12, %s2226_s17  ;;  %2144 = vrcp.f32 %v490_v49 }
 0x3f6   : > { %1596 = vrot.lane.b32.xlu0 %v2313_v15, %s2224_s14 }
 0x3f8   : > { %v640_v2 = vpop.xlane.xlu0 %639 }
 0x3f9   : > { %1421 = vrot.lane.b32.xlu1 %v2306_v14, %s2225_s16  ;;  %2146 = vrcp.f32 %v640_v2 }
 0x3fa   : > { %1769 = vrot.lane.b32.xlu0 %v2313_v15, %s2226_s17 }
 0x3fc   : > { %v487_v13 = vpop.xlane.xlu1 %486  ;;  %v810_v38 = vpop.xlane.xlu0 %809 }
 0x3fd   : > { %2148 = vrcp.f32 %v487_v13  ;;  %1594 = vrot.lane.b32.xlu1 %v2306_v14, %s2224_s14 }
 0x3fe   : > { %2150 = vrcp.f32 %v810_v38 }
 0x3ff   : > { %v2145_v12 = vpop.eup %2144 }
 0x400   : > { %v637_v4 = vpop.xlane.xlu1 %636  ;;  %v494_v54 = vmul.f32 %v2145_v12, %v490_v49 }
 0x401   : > { %2152 = vrcp.f32 %v637_v4  ;;  %1767 = vrot.lane.b32.xlu1 %v2306_v14, %s2226_s17 }
 0x402   : > { %v496_v15 = vsub.f32 2.0, %v494_v54 }
 0x403   : > { %v2147_v6 = vpop.eup %2146 }
 0x404   : > { %v807_v29 = vpop.xlane.xlu1 %806  ;;  %v644_v37 = vmul.f32 %v2147_v6, %v640_v2  ;;  %v498_v23 = vmul.f32 %v2145_v12, %v496_v15  ;;  %v2068_v15 = vpack.c.bf16 %v2634_v61, %v2644_v1 }
 0x405   : > { %2154 = vrcp.f32 %v807_v29 }
 0x406   : > { %v980_v7 = vpop.xlane.xlu0 %979  ;;  %v646_v31 = vsub.f32 2.0, %v644_v37  ;;  %v500_v44 = vmul.f32 %v2531_v8, %v498_v23 }
 0x407   : > { %v2149_v19 = vpop.eup %2148  ;;  %2156 = vrcp.f32 %v980_v7 }
 0x408   : > { %v2151_v9 = vpop.eup %2150  ;;  %v493_v42 = vmul.f32 %v2149_v19, %v487_v13  ;;  %v977_v34 = vpop.xlane.xlu1 %976  ;;  %v648_v48 = vmul.f32 %v2147_v6, %v646_v31 }
 0x409   : > { %2158 = vrcp.f32 %v977_v34  ;;  %v814_v56 = vmul.f32 %v2151_v9, %v810_v38 }
 0x40a   : > { %v495_v5 = vsub.f32 2.0, %v493_v42  ;;  %v650_v12 = vmul.f32 %v2536_v27, %v648_v48 }
 0x40b   : > { %v2153_v46 = vpop.eup %2152  ;;  %v816_v58 = vsub.f32 2.0, %v814_v56 }
 0x40c   : > { %v497_v55 = vmul.f32 %v2149_v19, %v495_v5  ;;  %v643_v14 = vmul.f32 %v2153_v46, %v637_v4 }
 0x40d   : > { %v818_v4 = vmul.f32 %v2151_v9, %v816_v58 }
 0x40e   : > { %v499_v28 = vmul.f32 %v2539_v16, %v497_v55  ;;  %v645_v30 = vsub.f32 2.0, %v643_v14 }
 0x40f   : > { %v2155_v59 = vpop.eup %2154 }
 0x410   : > { %v647_v50 = vmul.f32 %v2153_v46, %v645_v30  ;;  %v813_v33 = vmul.f32 %v2155_v59, %v807_v29  ;;  %1976 = vmatprep.mubr.msk.f32.mxu0 %vm472_vm2, %v499_v28  ;;  %v2064_v29 = vpack.c.bf16 %v2626_v35, %v2578_v41 }
 0x411   : > { %v2157_v49 = vpop.eup %2156  ;;  %1977 = vmatmul.mubr.msk.f32.vlgmr.msra.gmra.mrb[4].mxu0 %vm472_vm2, %v500_v44 }
 0x412   : > { %v649_v2 = vmul.f32 %v2553_v32, %v647_v50  ;;  %v815_v13 = vsub.f32 2.0, %v813_v33  ;;  %v984_v38 = vmul.f32 %v2157_v49, %v980_v7  ;;  %2055 = vmatpush3.bf16.msra.mxu0 %v2524_v3  ;;  %v820_v3 = vmul.f32 %v2543_v25, %v818_v4 }
 0x413   : > { %v2159_v16 = vpop.eup %2158  ;;  %2061 = vmatprep.subr.bf16.mxu0 %v2335_v22 }
 0x414   : > { %v817_v8 = vmul.f32 %v2155_v59, %v815_v13  ;;  %v986_v54 = vsub.f32 2.0, %v984_v38  ;;  %v983_v6 = vmul.f32 %v2159_v16, %v977_v34  ;;  %1983 = vmatprep.mubr.msk.f32.mxu1 %vm472_vm2, %v649_v2 }
 0x415   : > { %1984 = vmatmul.mubr.msk.f32.vlgmr.msra.gmra.mrb[4].mxu1 %vm472_vm2, %v650_v12 }
 0x416   : > { %v819_v32 = vmul.f32 %v2565_v45, %v817_v8  ;;  %v985_v7 = vsub.f32 2.0, %v983_v6  ;;  %2059 = vmatpush3.bf16.msra.mxu1 %v2561_v40  ;;  %v988_v27 = vmul.f32 %v2157_v49, %v986_v54 }
 0x417   : > { %2065 = vmatprep.subr.bf16.mxu1 %v2064_v29 }
 0x418   : > { %v987_v19 = vmul.f32 %v2159_v16, %v985_v7  ;;  %1990 = vmatprep.mubr.msk.f32.mxu0 %vm472_vm2, %v819_v32  ;;  %v990_v45 = vmul.f32 %v2572_v57, %v988_v27 }
 0x419   : > { %1991 = vmatmul.mubr.msk.f32.vlgmr.msra.gmra.mrb[6].mxu0 %vm472_vm2, %v820_v3 }
 0x41a   : > { %v989_v37 = vmul.f32 %v2568_v47, %v987_v19  ;;  %2063 = vmatpush3.bf16.msra.mxu0 %v2335_v22 }
 0x41b   : > { %2069 = vmatprep.subr.bf16.mxu0 %v2068_v15 }
 0x41c   : > { %1997 = vmatprep.mubr.msk.f32.mxu1 %vm472_vm2, %v989_v37 }
 0x41d   : > { %1998 = vmatmul.mubr.msk.f32.vlgmr.msra.gmra.mrb[6].mxu1 %vm472_vm2, %v990_v45 }
 0x41e   : > { %2067 = vmatpush3.bf16.msra.mxu1 %v2064_v29 }
 0x445   : > { %v1153_v25 = vpop.xlane.xlu1 %1152 }
 0x446   : > { %2160 = vrcp.f32 %v1153_v25 }
 0x44d   : > { %v1156_v40 = vpop.xlane.xlu0 %1155 }
 0x44e   : > { %2162 = vrcp.f32 %v1156_v40 }
 0x450   : > { %v2161_v9 = vpop.eup %2160 }
 0x451   : > { %v1159_v42 = vmul.f32 %v2161_v9, %v1153_v25  ;;  %v1309_v34 = vpop.xlane.xlu0 %1308 }
 0x452   : > { %2164 = vrcp.f32 %v1309_v34 }
 0x453   : > { %v1161_v5 = vsub.f32 2.0, %v1159_v42 }
 0x455   : > { %v1163_v46 = vmul.f32 %v2161_v9, %v1161_v5  ;;  %v1482_v47 = vpop.xlane.xlu0 %1481 }
 0x456   : > { %2166 = vrcp.f32 %v1482_v47 }
 0x457   : > { %v1165_v22 = vmul.f32 %v2583_v53, %v1163_v46 }
 0x458   : > { %v2163_v57 = vpop.eup %2162 }
 0x459   : > { %v1160_v23 = vmul.f32 %v2163_v57, %v1156_v40  ;;  %2004 = vmatprep.mubr.msk.f32.mxu0 %vm472_vm2, %v1165_v22  ;;  %v1655_v56 = vpop.xlane.xlu0 %1654 }
 0x45b   : > { %v1162_v31 = vsub.f32 2.0, %v1160_v23 }
 0x45c   : > { %v2165_v30 = vpop.eup %2164 }
 0x45d   : > { %v1164_v55 = vmul.f32 %v2163_v57, %v1162_v31  ;;  %v1306_v14 = vpop.xlane.xlu1 %1305  ;;  %v1313_v53 = vmul.f32 %v2165_v30, %v1309_v34  ;;  %v2682_v13 = vpop.permute.xlu0 %1668 }
 0x45e   : > { %2168 = vrcp.f32 %v1306_v14 }
 0x45f   : > { %v1166_v28 = vmul.f32 %v2589_v43, %v1164_v55  ;;  %2170 = vrcp.f32 %v1655_v56  ;;  %v1315_v50 = vsub.f32 2.0, %v1313_v53 }
 0x460   : > { %v2167_v44 = vpop.eup %2166 }
 0x461   : > { %v1479_v59 = vpop.xlane.xlu1 %1478  ;;  %2005 = vmatmul.mubr.msk.f32.vlgmr.msra.gmra.mrb[8].mxu0 %vm472_vm2, %v1166_v28  ;;  %v1486_v33 = vmul.f32 %v2167_v44, %v1482_v47  ;;  %v1317_v4 = vmul.f32 %v2165_v30, %v1315_v50 }
 0x462   : > { %2172 = vrcp.f32 %v1479_v59  ;;  %2071 = vmatpush3.bf16.msra.mxu0 %v2068_v15 }
 0x463   : > { %v1488_v8 = vsub.f32 2.0, %v1486_v33  ;;  %v1319_v27 = vmul.f32 %v2594_v11, %v1317_v4 }
 0x465   : > { %v1652_v48 = vpop.xlane.xlu1 %1651  ;;  %v1490_v19 = vmul.f32 %v2167_v44, %v1488_v8  ;;  %v755_v8 = vpop.permute.xlu0 %754 }
 0x466   : > { %2174 = vrcp.f32 %v1652_v48 }
 0x467   : > { %v1492_v9 = vmul.f32 %v2599_v24, %v1490_v19 }
 0x468   : > { %v2169_v58 = vpop.eup %2168 }
 0x469   : > { %v2171_v49 = vpop.eup %2170  ;;  %v1312_v2 = vmul.f32 %v2169_v58, %v1306_v14  ;;  %v2684_v38 = vpop.permute.xlu1 %1666 }
 0x46a   : > { %v2072_v43 = vpack.c.bf16 %v2682_v13, %v2684_v38  ;;  %v1659_v54 = vmul.f32 %v2171_v49, %v1655_v56 }
 0x46b   : > { %v1314_v16 = vsub.f32 2.0, %v1312_v2 }
 0x46c   : > { %v2173_v12 = vpop.eup %2172  ;;  %2073 = vmatprep.subr.bf16.mxu1 %v2072_v43  ;;  %v1661_v15 = vsub.f32 2.0, %v1659_v54 }
 0x46d   : > { %v1316_v6 = vmul.f32 %v2169_v58, %v1314_v16  ;;  %v1485_v29 = vmul.f32 %v2173_v12, %v1479_v59 }
 0x46e   : > { %v1663_v42 = vmul.f32 %v2171_v49, %v1661_v15  ;;  %v2208_v15 = vld [vmem:[%s2295_s11] sm:$0xff] }
 0x46f   : > { %v1318_v32 = vmul.f32 %v2608_v60, %v1316_v6  ;;  %v1487_v7 = vsub.f32 2.0, %v1485_v29 }
 0x470   : > { %v2175_v3 = vpop.eup %2174  ;;  %v1665_v34 = vmul.f32 %v2604_v10, %v1663_v42 }
 0x471   : > { %v1489_v37 = vmul.f32 %v2173_v12, %v1487_v7  ;;  %v1658_v45 = vmul.f32 %v2175_v3, %v1652_v48  ;;  %2011 = vmatprep.mubr.msk.f32.mxu1 %vm472_vm2, %v1318_v32  ;;  %v753_v32 = vpop.permute.xlu1 %752 }
 0x472   : > { %2012 = vmatmul.mubr.msk.f32.vlgmr.msra.gmra.mrb[8].mxu1 %vm472_vm2, %v1319_v27 }
 0x473   : > { %v1491_v25 = vmul.f32 %v2612_v52, %v1489_v37  ;;  %v1660_v40 = vsub.f32 2.0, %v1658_v45  ;;  %2075 = vmatpush3.bf16.msra.mxu1 %v2072_v43 }
 0x475   : > { %v1662_v60 = vmul.f32 %v2175_v3, %v1660_v40  ;;  %2018 = vmatprep.mubr.msk.f32.mxu0 %vm472_vm2, %v1491_v25  ;;  %v2209_v25 = vld [vmem:[%s2295_s11 + $0x8] sm:$0xff] }
 0x476   : > { %2019 = vmatmul.mubr.msk.f32.vlgmr.msra.gmra.mrb[10].mxu0 %vm472_vm2, %v1492_v9 }
 0x477   : > { %v1664_v11 = vmul.f32 %v2616_v51, %v1662_v60 }
 0x479   : > { %2025 = vmatprep.mubr.msk.f32.mxu1 %vm472_vm2, %v1664_v11 }
 0x47a   : > { %2026 = vmatmul.mubr.msk.f32.vlgmr.msra.gmra.mrb[10].mxu1 %vm472_vm2, %v1665_v34  ;;  %v925_v34 = vpop.permute.xlu0 %924 }
 0x4e4   : > { %v1978_v5 = vpop.f32.mrb[4].mxu0 }
 0x4e5   : > { %v585_v52 = vmin.f32 %v1978_v5, 0.0  ;;  %v573_v46 = vpop.f32.mrb[5].mxu0  ;;  %vm583_vm1 = vcmp.gt.f32.partialorder %v1978_v5, 0.0 }
 0x4e6   : > { %v584_v47 = vmin.f32 %v573_v46, 0.0  ;;  %vm582_vm2 = vcmp.gt.f32.partialorder %v573_v46, 0.0 }
 0x4e7   : > { %v588_v22 = vmul.f32 1.442695, %v585_v52 }
 0x4e8   : > { %v586_v24 = vmul.f32 1.442695, %v584_v47  ;;  %v1985_v57 = vpop.f32.mrb[4].mxu1 }
 0x4e9   : > { %2176 = vpow2.f32 %v588_v22  ;;  %v741_v23 = vmin.f32 %v1985_v57, 0.0  ;;  %v729_v31 = vpop.f32.mrb[5].mxu1  ;;  %vm739_vm7 = vcmp.gt.f32.partialorder %v1985_v57, 0.0 }
 0x4ea   : > { %2178 = vpow2.f32 %v586_v24  ;;  %v740_v56 = vmin.f32 %v729_v31, 0.0  ;;  %vm738_vm8 = vcmp.gt.f32.partialorder %v729_v31, 0.0 }
 0x4eb   : > { %v744_v55 = vmul.f32 1.442695, %v741_v23 }
 0x4ec   : > { %v742_v51 = vmul.f32 1.442695, %v740_v56  ;;  %v1992_v14 = vpop.f32.mrb[6].mxu0 }
 0x4ed   : > { %2180 = vpow2.f32 %v744_v55  ;;  %v911_v10 = vmin.f32 %v1992_v14, 0.0  ;;  %v899_v28 = vpop.f32.mrb[7].mxu0  ;;  %vm909_vm9 = vcmp.gt.f32.partialorder %v1992_v14, 0.0 }
 0x4ee   : > { %2182 = vpow2.f32 %v742_v51  ;;  %v910_v30 = vmin.f32 %v899_v28, 0.0  ;;  %vm908_vm10 = vcmp.gt.f32.partialorder %v899_v28, 0.0 }
 0x4ef   : > { %v914_v59 = vmul.f32 1.442695, %v911_v10  ;;  %v1095_v10 = vpop.permute.xlu0 %1094 }
 0x4f0   : > { %v912_v53 = vmul.f32 1.442695, %v910_v30  ;;  %v2700_v44 = vpop.f32.mrb[6].mxu1 }
 0x4f1   : > { %2184 = vpow2.f32 %v914_v59  ;;  %v1081_v48 = vmin.f32 %v2700_v44, 0.0  ;;  %v2703_v58 = vpop.f32.mrb[7].mxu1  ;;  %vm1079_vm11 = vcmp.gt.f32.partialorder %v2700_v44, 0.0 }
 0x4f2   : > { %2186 = vpow2.f32 %v912_v53  ;;  %v1080_v50 = vmin.f32 %v2703_v58, 0.0  ;;  %vm1078_vm12 = vcmp.gt.f32.partialorder %v2703_v58, 0.0 }
 0x4f3   : > { %v2177_v33 = vpop.eup %2176  ;;  %v1084_v49 = vmul.f32 1.442695, %v1081_v48 }
 0x4f4   : > { %v2179_v2 = vpop.eup %2178  ;;  %v1861_v43 = vadd.f32 -1.0, %v2177_v33  ;;  %v1082_v16 = vmul.f32 1.442695, %v1080_v50 }
 0x4f5   : > { %v1860_v12 = vadd.f32 -1.0, %v2179_v2  ;;  %2188 = vpow2.f32 %v1084_v49 }
 0x4f6   : > { %v593_v4 = vsel %vm583_vm1, %v1978_v5, %v1861_v43  ;;  %2190 = vpow2.f32 %v1082_v16 }
 0x4f7   : > { %v2181_v54 = vpop.eup %2180  ;;  %v595_v6 = vadd.f32 %v2317_v17, %v593_v4  ;;  %v592_v29 = vsel %vm582_vm2, %v573_v46, %v1860_v12  ;;  %v923_v46 = vpop.permute.xlu1 %922  ;;  %vm768_vm2 = vcmask 130112  }
 0x4f8   : > { %v2183_v7 = vpop.eup %2182  ;;  %v594_v3 = vadd.f32 %v592_v29, %v2319_v18  ;;  %v1865_v27 = vadd.f32 -1.0, %v2181_v54 }
 0x4f9   : > { %v1864_v19 = vadd.f32 -1.0, %v2183_v7  ;;  %v597_v40 = vadd.f32 %v2209_v25, %v595_v6 }
 0x4fa   : > { %v596_v37 = vadd.f32 %v2208_v15, %v594_v3  ;;  %v749_v17 = vsel %vm739_vm7, %v1985_v57, %v1865_v27  ;;  %vm938_vm7 = vcmask 195712  }
 0x4fb   : > { %v2185_v45 = vpop.eup %2184  ;;  %v751_v18 = vadd.f32 %v749_v17, %v2545_v26  ;;  %v748_v9 = vsel %vm738_vm8, %v729_v31, %v1864_v19  ;;  %600 = vst.msk [vmem:[%s2713_s20 + $0x8] sm:$0xff] %vm598_vm3, %v597_v40  ;;  %vm1108_vm8 = vcmask 261312  }
 0x4fc   : > { %v2187_v42 = vpop.eup %2186  ;;  %599 = vst.msk [vmem:[%s2713_s20] sm:$0xff] %vm598_vm3, %v596_v37  ;;  %v1869_v60 = vadd.f32 -1.0, %v2185_v45  ;;  %v750_v11 = vadd.f32 %v748_v9, %v2514_v62 }
 0x4fd   : > { %v1868_v5 = vadd.f32 -1.0, %v2187_v42  ;;  %v759_v52 = vadd.f32 %v755_v8, %v751_v18 }
 0x4fe   : > { %v758_v47 = vadd.f32 %v753_v32, %v750_v11  ;;  %v919_v22 = vsel %vm909_vm9, %v1992_v14, %v1869_v60 }
 0x4ff   : > { %v2189_v24 = vpop.eup %2188  ;;  %764 = vrot.lane.b32.xlu0 %v759_v52, %s2227_s21  ;;  %v921_v26 = vadd.f32 %v919_v22, %v2519_v0  ;;  %v918_v57 = vsel %vm908_vm10, %v899_v28, %v1868_v5  ;;  %v1093_v28 = vpop.permute.xlu1 %1092 }
 0x500   : > { %v2191_v23 = vpop.eup %2190  ;;  %v1873_v31 = vadd.f32 -1.0, %v2189_v24  ;;  %762 = vrot.lane.b32.xlu1 %v758_v47, %s2227_s21  ;;  %v920_v62 = vadd.f32 %v918_v57, %v2516_v63 }
 0x501   : > { %v1872_v56 = vadd.f32 -1.0, %v2191_v23  ;;  %v929_v55 = vadd.f32 %v925_v34, %v921_v26 }
 0x502   : > { %v928_v51 = vadd.f32 %v923_v46, %v920_v62  ;;  %v1089_v14 = vsel %vm1079_vm11, %v2700_v44, %v1873_v31 }
 0x503   : > { %934 = vrot.lane.b32.xlu0 %v929_v55, %s2228_s22  ;;  %v1091_v0 = vadd.f32 %v1089_v14, %v2557_v39  ;;  %v1088_v30 = vsel %vm1078_vm12, %v2703_v58, %v1872_v56  ;;  %v1422_v11 = vpop.permute.xlu1 %1421 }
 0x504   : > { %932 = vrot.lane.b32.xlu1 %v928_v51, %s2228_s22  ;;  %v1090_v63 = vadd.f32 %v1088_v30, %v2555_v36 }
 0x505   : > { %v1099_v59 = vadd.f32 %v1095_v10, %v1091_v0 }
 0x506   : > { %v1098_v53 = vadd.f32 %v1093_v28, %v1090_v63 }
 0x507   : > { %1104 = vrot.lane.b32.xlu0 %v1099_v59, %s2229_s23  ;;  %v1595_v55 = vpop.permute.xlu1 %1594 }
 0x508   : > { %1102 = vrot.lane.b32.xlu1 %v1098_v53, %s2229_s23 }
 0x534   : > { %v2006_v44 = vpop.f32.mrb[8].mxu0 }
 0x535   : > { %v1251_v48 = vmin.f32 %v2006_v44, 0.0  ;;  %v1239_v50 = vpop.f32.mrb[9].mxu0  ;;  %vm1249_vm13 = vcmp.gt.f32.partialorder %v2006_v44, 0.0 }
 0x536   : > { %v1250_v33 = vmin.f32 %v1239_v50, 0.0  ;;  %vm1248_vm14 = vcmp.gt.f32.partialorder %v1239_v50, 0.0 }
 0x537   : > { %v1254_v49 = vmul.f32 1.442695, %v1251_v48 }
 0x538   : > { %v1252_v39 = vmul.f32 1.442695, %v1250_v33  ;;  %v1768_v33 = vpop.permute.xlu1 %1767 }
 0x539   : > { %2192 = vpow2.f32 %v1254_v49 }
 0x53a   : > { %2194 = vpow2.f32 %v1252_v39 }
 0x543   : > { %v2193_v58 = vpop.eup %2192 }
 0x544   : > { %v2195_v2 = vpop.eup %2194  ;;  %v1877_v43 = vadd.f32 -1.0, %v2193_v58 }
 0x545   : > { %v1876_v36 = vadd.f32 -1.0, %v2195_v2  ;;  %v2013_v16 = vpop.f32.mrb[8].mxu1 }
 0x546   : > { %v1259_v12 = vsel %vm1249_vm13, %v2006_v44, %v1877_v43  ;;  %v1410_v4 = vmin.f32 %v2013_v16, 0.0  ;;  %v1398_v8 = vpop.f32.mrb[9].mxu1  ;;  %vm1408_vm15 = vcmp.gt.f32.partialorder %v2013_v16, 0.0 }
 0x547   : > { %v2738_v54 = vadd.f32 %v2327_v20, %v1259_v12  ;;  %v1258_v6 = vsel %vm1248_vm14, %v1239_v50, %v1876_v36  ;;  %v1409_v29 = vmin.f32 %v1398_v8, 0.0  ;;  %vm1407_vm0 = vcmp.gt.f32.partialorder %v1398_v8, 0.0  ;;  %v2210_v36 = vld [vmem:[%s2295_s11 + $0x10] sm:$0xff] }
 0x548   : > { %v2741_v32 = vadd.f32 %v1258_v6, %v2329_v21  ;;  %v1413_v7 = vmul.f32 1.442695, %v1410_v4  ;;  %v1424_v21 = vpop.permute.xlu0 %1423  ;;  %v2211_v4 = vld [vmem:[%s2295_s11 + $0x18] sm:$0xff] }
 0x549   : > { %v1411_v3 = vmul.f32 1.442695, %v1409_v29  ;;  %v2020_v27 = vpop.f32.mrb[10].mxu0 }
 0x54a   : > { %2196 = vpow2.f32 %v1413_v7  ;;  %v1583_v19 = vmin.f32 %v2020_v27, 0.0  ;;  %v1571_v15 = vpop.f32.mrb[11].mxu0  ;;  %vm1581_vm4 = vcmp.gt.f32.partialorder %v2020_v27, 0.0 }
 0x54b   : > { %2198 = vpow2.f32 %v1411_v3  ;;  %v1582_v37 = vmin.f32 %v1571_v15, 0.0  ;;  %vm1580_vm5 = vcmp.gt.f32.partialorder %v1571_v15, 0.0 }
 0x54c   : > { %v1586_v17 = vmul.f32 1.442695, %v1583_v19  ;;  %v1597_v31 = vpop.permute.xlu0 %1596 }
 0x54d   : > { %v1584_v45 = vmul.f32 1.442695, %v1582_v37  ;;  %v2027_v25 = vpop.f32.mrb[10].mxu1 }
 0x54e   : > { %2200 = vpow2.f32 %v1586_v17  ;;  %v1756_v40 = vmin.f32 %v2027_v25, 0.0  ;;  %v1744_v20 = vpop.f32.mrb[11].mxu1  ;;  %vm1754_vm6 = vcmp.gt.f32.partialorder %v2027_v25, 0.0 }
 0x54f   : > { %2202 = vpow2.f32 %v1584_v45  ;;  %v1755_v18 = vmin.f32 %v1744_v20, 0.0  ;;  %vm1753_vm1 = vcmp.gt.f32.partialorder %v1744_v20, 0.0 }
 0x550   : > { %v1759_v9 = vmul.f32 1.442695, %v1756_v40  ;;  %v1770_v48 = vpop.permute.xlu0 %1769 }
 0x551   : > { %v1757_v42 = vmul.f32 1.442695, %v1755_v18 }
 0x552   : > { %2204 = vpow2.f32 %v1759_v9 }
 0x553   : > { %2206 = vpow2.f32 %v1757_v42 }
 0x554   : > { %v2197_v60 = vpop.eup %2196 }
 0x555   : > { %v2199_v34 = vpop.eup %2198  ;;  %v1881_v5 = vadd.f32 -1.0, %v2197_v60 }
 0x556   : > { %v1880_v52 = vadd.f32 -1.0, %v2199_v34 }
 0x557   : > { %v1418_v46 = vsel %vm1408_vm15, %v2013_v16, %v1881_v5  ;;  %v1262_v16 = vadd.f32 %v2210_v36, %v2741_v32 }
 0x558   : > { %v2201_v47 = vpop.eup %2200  ;;  %v1420_v22 = vadd.f32 %v1418_v46, %v2626_v35  ;;  %v1417_v24 = vsel %vm1407_vm0, %v1398_v8, %v1880_v52  ;;  %v1263_v8 = vadd.f32 %v2211_v4, %v2738_v54 }
 0x559   : > { %v2203_v26 = vpop.eup %2202  ;;  %v1885_v57 = vadd.f32 -1.0, %v2201_v47  ;;  %v1419_v23 = vadd.f32 %v1417_v24, %v2578_v41  ;;  %1264 = vst.msk [vmem:[%s2713_s20 + $0x10] sm:$0xff] %vm598_vm3, %v1262_v16 }
 0x55a   : > { %v1884_v62 = vadd.f32 -1.0, %v2203_v26  ;;  %v1428_v56 = vadd.f32 %v1424_v21, %v1420_v22  ;;  %1265 = vst.msk [vmem:[%s2713_s20 + $0x18] sm:$0xff] %vm598_vm3, %v1263_v8 }
 0x55b   : > { %v1427_v51 = vadd.f32 %v1422_v11, %v1419_v23  ;;  %v1591_v14 = vsel %vm1581_vm4, %v2020_v27, %v1885_v57 }
 0x55c   : > { %v2205_v10 = vpop.eup %2204  ;;  %v1590_v0 = vsel %vm1580_vm5, %v1571_v15, %v1884_v62  ;;  %1433 = vrot.lane.b32.xlu0 %v1428_v56, %s2227_s21  ;;  %v1593_v28 = vadd.f32 %v1591_v14, %v2634_v61 }
 0x55d   : > { %v2207_v35 = vpop.eup %2206  ;;  %v1889_v30 = vadd.f32 -1.0, %v2205_v10  ;;  %1431 = vrot.lane.b32.xlu1 %v1427_v51, %s2227_s21  ;;  %v1592_v41 = vadd.f32 %v1590_v0, %v2644_v1 }
 0x55e   : > { %v1888_v63 = vadd.f32 -1.0, %v2207_v35  ;;  %v1601_v59 = vadd.f32 %v1597_v31, %v1593_v28 }
 0x55f   : > { %v1600_v53 = vadd.f32 %v1595_v55, %v1592_v41  ;;  %v1764_v44 = vsel %vm1754_vm6, %v2027_v25, %v1889_v30 }
 0x560   : > { %v1763_v50 = vsel %vm1753_vm1, %v1744_v20, %v1888_v63  ;;  %1606 = vrot.lane.b32.xlu0 %v1601_v59, %s2228_s22  ;;  %v1766_v61 = vadd.f32 %v1764_v44, %v2682_v13 }
 0x561   : > { %1604 = vrot.lane.b32.xlu1 %v1600_v53, %s2228_s22  ;;  %v1765_v1 = vadd.f32 %v1763_v50, %v2684_v38 }
 0x562   : > { %v1774_v49 = vadd.f32 %v1770_v48, %v1766_v61 }
 0x563   : > { %v1773_v39 = vadd.f32 %v1768_v33, %v1765_v1 }
 0x564   : > { %1779 = vrot.lane.b32.xlu0 %v1774_v49, %s2229_s23 }
 0x565   : > { %1777 = vrot.lane.b32.xlu1 %v1773_v39, %s2229_s23 }
 0x571   : > { %v765_v58 = vpop.permute.xlu0 %764 }
 0x572   : > { %v763_v2 = vpop.permute.xlu1 %762  ;;  %770 = vst.msk [vmem:[%s2713_s20 + $0x8] sm:$0xff] %vm768_vm2, %v765_v58 }
 0x573   : > { %769 = vst.msk [vmem:[%s2713_s20] sm:$0xff] %vm768_vm2, %v763_v2 }
 0x575   : > { %v935_v13 = vpop.permute.xlu0 %934 }
 0x576   : > { %v933_v38 = vpop.permute.xlu1 %932  ;;  %940 = vst.msk [vmem:[%s2713_s20 + $0x8] sm:$0xff] %vm938_vm7, %v935_v13 }
 0x577   : > { %939 = vst.msk [vmem:[%s2713_s20] sm:$0xff] %vm938_vm7, %v933_v38 }
 0x579   : > { %v1105_v12 = vpop.permute.xlu0 %1104 }
 0x57a   : > { %v1103_v43 = vpop.permute.xlu1 %1102  ;;  %1110 = vst.msk [vmem:[%s2713_s20 + $0x8] sm:$0xff] %vm1108_vm8, %v1105_v12 }
 0x57b   : > { %1109 = vst.msk [vmem:[%s2713_s20] sm:$0xff] %vm1108_vm8, %v1103_v43 }
 0x5ce   : > { %v1434_v6 = vpop.permute.xlu0 %1433 }
 0x5cf   : > { %v1432_v29 = vpop.permute.xlu1 %1431  ;;  %1438 = vst.msk [vmem:[%s2713_s20 + $0x18] sm:$0xff] %vm768_vm2, %v1434_v6 }
 0x5d0   : > { %1437 = vst.msk [vmem:[%s2713_s20 + $0x10] sm:$0xff] %vm768_vm2, %v1432_v29 }
 0x5d2   : > { %v1607_v32 = vpop.permute.xlu0 %1606 }
 0x5d3   : > { %v1605_v7 = vpop.permute.xlu1 %1604  ;;  %1611 = vst.msk [vmem:[%s2713_s20 + $0x18] sm:$0xff] %vm938_vm7, %v1607_v32 }
 0x5d4   : > { %1610 = vst.msk [vmem:[%s2713_s20 + $0x10] sm:$0xff] %vm938_vm7, %v1605_v7 }
 0x5d6   : > { %v1780_v54 = vpop.permute.xlu0 %1779 }
 0x5d7   : > { %v1778_v3 = vpop.permute.xlu1 %1777  ;;  %1784 = vst.msk [vmem:[%s2713_s20 + $0x18] sm:$0xff] %vm1108_vm8, %v1780_v54 }
 0x5d8   : > { %1783 = vst.msk [vmem:[%s2713_s20 + $0x10] sm:$0xff] %vm1108_vm8, %v1778_v3 }
 0x5d9 PF: > { %s14_s15 = sadd.s32 1, %s2218_s15  }
 0x5da   : > { %p11_p4 = scmp.ge.s32.totalorder %s14_s15, 4  }
 0x5dc   :  { %13 = sbr.rel (!%p11_p4) target bundleno = 1 (0x1), region = 66 }

</bundles_post_ra>
